<compile_context>
chip_gen: v5e
topology: v5e:2x2
jax: 0.10.0
libtpu: 0.0.40
codegen_flags: <defaults>
</compile_context>

<pallas_src>
import functools

import numpy as np
import jax
import jax.numpy as jnp
from jax.experimental import pallas as pl
from jax.experimental.pallas import tpu as pltpu


# --------------------------------------------------------------------------
# Kernels
# --------------------------------------------------------------------------
def _project(e_flat, w, b):
    """(R, E) @ (E, 2*H*E) + bias, f32 accumulation, single cast to w.dtype."""
    y = jnp.dot(e_flat, w, preferred_element_type=jnp.float32) + b
    return y.astype(w.dtype)


def _score_heads_into(out_ref, proj_i, proj_j, *, n_heads, e_size, nj):
    """proj_i: (Bb, Ni, 2HE) = [scale*q | k]; proj_j: (Bb, Nj, 2HE).

    Writes the fused lane-packed scores (Bb, Ni, 2*H*Nj):
      lanes [h*Nj:(h+1)*Nj]        = a_i head h = scale*q_i @ k_j^T
      lanes [(H+h)*Nj:(H+h+1)*Nj]  = a_j head h = k_i @ (scale*q_j)^T
    Each head block is written straight into the output ref (no concatenate).
    """
    he = n_heads * e_size
    odt = out_ref.dtype
    for h in range(n_heads):                      # static, unrolled (H is tiny)
        lo, hi = h * e_size, (h + 1) * e_size
        q_i = proj_i[:, :, lo:hi]                 # (Bb, Ni, E), scale folded in
        k_i = proj_i[:, :, he + lo:he + hi]
        q_j = proj_j[:, :, lo:hi]                 # (Bb, Nj, E), scale folded in
        k_j = proj_j[:, :, he + lo:he + hi]
        a_i = jnp.einsum('bie,bje->bij', q_i, k_j,
                         preferred_element_type=jnp.float32)
        a_j = jnp.einsum('bie,bje->bij', k_i, q_j,
                         preferred_element_type=jnp.float32)
        out_ref[:, :, h * nj:(h + 1) * nj] = a_i.astype(odt)
        out_ref[:, :, (n_heads + h) * nj:(n_heads + h + 1) * nj] = a_j.astype(odt)


def _cross_attn_kernel(ei_ref, ej_ref, w_ref, b_ref, out_ref, *, n_heads, e_size):
    bb, ni, _ = ei_ref.shape
    _, nj, _ = ej_ref.shape
    w, b = w_ref[...], b_ref[...]
    # One wide projection per graph side for the whole Bb-batch.
    proj_i = _project(ei_ref[...].reshape(bb * ni, e_size), w, b).reshape(bb, ni, -1)
    proj_j = _project(ej_ref[...].reshape(bb * nj, e_size), w, b).reshape(bb, nj, -1)
    _score_heads_into(out_ref, proj_i, proj_j,
                      n_heads=n_heads, e_size=e_size, nj=nj)


def _cross_attn_pool_kernel(ei_ref, ej_ref, w_ref, b_ref, prow_ref, pcol_ref,
                            out_ref, *, n_heads, e_size, d):
    # AdaptiveAvgPool2d is linear with rows summing to 1, so it commutes
    # exactly with the affine q/k projection: pool the flattened, Bb-batched
    # embeddings with a block-diagonal pooling matrix first, then run the
    # whole attention on (Bb*d, E) tiles.
    bb, ni, _ = ei_ref.shape
    _, nj, _ = ej_ref.shape
    w, b = w_ref[...], b_ref[...]
    cdt = w.dtype
    ei_p = jnp.dot(prow_ref[...], ei_ref[...].reshape(bb * ni, e_size),
                   preferred_element_type=jnp.float32).astype(cdt)    # (Bb*d, E)
    ej_p = jnp.dot(pcol_ref[...], ej_ref[...].reshape(bb * nj, e_size),
                   preferred_element_type=jnp.float32).astype(cdt)    # (Bb*d, E)
    # Note: the reshape below is sublane-aligned whenever d % 8 == 0 (typical
    # pooling_res); otherwise Mosaic inserts a small relayout copy.
    proj_i = _project(ei_p, w, b).reshape(bb, d, -1)
    proj_j = _project(ej_p, w, b).reshape(bb, d, -1)
    _score_heads_into(out_ref, proj_i, proj_j,
                      n_heads=n_heads, e_size=e_size, nj=d)


# --------------------------------------------------------------------------
# Glue (one-time parameter fusion, pooling matrices, pallas_call wiring)
# --------------------------------------------------------------------------
def adaptive_pool_matrix(n, d):
    """Exact linear operator equivalent of torch AdaptiveAvgPool1d(n -> d)."""
    P = np.zeros((d, n), dtype=np.float32)
    for i in range(d):
        start = (i * n) // d
        end = -((-(i + 1) * n) // d)           # ceil((i+1)*n/d)
        P[i, start:end] = 1.0 / (end - start)
    return P


def prepare_params(params, *, n_heads, embedding_size,
                   compute_dtype=jnp.bfloat16):
    """One-time fusion of the q/k linear layers (call OUTSIDE the hot path).

    Returns
      w_qk: (E, 2*H*E) = [scale*Wq | Wk]
      b_qk: (1, 2*H*E) = [scale*bq | bk]
    Folding `scale` into the q half keeps both a_i and a_j exact and removes
    the per-tile VPU multiply from the kernel.  Scale is folded in f32 before
    the cast to the compute dtype.
    """
    E, H = embedding_size, n_heads
    he = H * E
    scale = float(E) ** (-0.5)
    wq, wk = params["wq"], params["wk"]
    bq = params.get("bq", jnp.zeros((he,), wq.dtype))
    bk = params.get("bk", jnp.zeros((he,), wk.dtype))
    w_qk = jnp.concatenate([wq * scale, wk], axis=1).astype(compute_dtype)
    b_qk = jnp.concatenate([bq * scale, bk]).reshape(1, 2 * he).astype(compute_dtype)
    return w_qk, b_qk


def _choose_block_batch(batch, rows, target_rows=256):
    """Largest divisor of `batch` that keeps >= 2 grid steps (so v7x's two
    TensorCores both get work), stopping as soon as Bb*rows reaches the MXU
    row target."""
    divisors = [d for d in range(1, batch + 1) if batch % d == 0]
    candidates = [d for d in divisors if batch // d >= 2] or [batch]
    for d in candidates:
        if d * rows >= target_rows:
            return d
    return candidates[-1]


def _pad_nodes(x, multiple=8):
    """Zero-pad the node axis to a multiple of 8 (sublane-aligned reshapes)."""
    n = x.shape[1]
    pad = (-n) % multiple
    if pad:
        x = jnp.pad(x, ((0, 0), (0, pad), (0, 0)))
    return x, n + pad


def _padded_block_bytes(shape, dtype):
    """VMEM bytes of one block after (8, 128) tile padding."""
    shape = tuple(int(s) for s in shape)
    lead = int(np.prod(shape[:-2], dtype=np.int64)) if len(shape) > 2 else 1
    s = shape[-2] if len(shape) >= 2 else 1
    l = shape[-1]
    return lead * (-(-s // 8) * 8) * (-(-l // 128) * 128) * np.dtype(dtype).itemsize


def cross_transformer_forward(embeddings_i, mask_i, embeddings_j, mask_j,
                              w_qk, b_qk, *, n_heads, embedding_size,
                              dataset="AIDS700nef", pooling_res=None,
                              compute_dtype=jnp.bfloat16, out_dtype=jnp.float32,
                              block_batch=None, packed_output=False,
                              mask_ij=None):
    # Masks are accepted but unused — exactly like the PyTorch forward.
    del mask_i, mask_j, mask_ij
    B, Ni, E = embeddings_i.shape
    _, Nj, _ = embeddings_j.shape
    H = n_heads
    he = H * E
    assert E == embedding_size and tuple(w_qk.shape) == (E, 2 * he)

    ei = embeddings_i.astype(compute_dtype)
    ej = embeddings_j.astype(compute_dtype)
    w_qk = w_qk.astype(compute_dtype)
    b_qk = b_qk.reshape(1, 2 * he).astype(compute_dtype)

    # Keep all in-kernel reshapes sublane-aligned (pad sliced off afterwards).
    ei, Ni_p = _pad_nodes(ei)
    ej, Nj_p = _pad_nodes(ej)

    if block_batch is None:
        Bb = _choose_block_batch(B, max(Ni_p, Nj_p))
    else:
        Bb = block_batch
        if B % Bb:
            raise ValueError(f"block_batch={Bb} must divide batch={B}")
    grid = (B // Bb,)

    ei_spec = pl.BlockSpec((Bb, Ni_p, E), lambda g: (g, 0, 0))
    ej_spec = pl.BlockSpec((Bb, Nj_p, E), lambda g: (g, 0, 0))
    # Constant index maps -> weights / bias fetched once, VMEM-resident.
    w_spec = pl.BlockSpec((E, 2 * he), lambda g: (0, 0))
    b_spec = pl.BlockSpec((1, 2 * he), lambda g: (0, 0))

    pooled = dataset == "IMDBMulti"
    if pooled:
        d = pooling_res
        rows, cols = d, d
        pr = np.pad(adaptive_pool_matrix(Ni, d), ((0, 0), (0, Ni_p - Ni)))
        pc = np.pad(adaptive_pool_matrix(Nj, d), ((0, 0), (0, Nj_p - Nj)))
        eye = np.eye(Bb, dtype=np.float32)
        prow = jnp.asarray(np.kron(eye, pr), dtype=compute_dtype)  # (Bb*d, Bb*Ni_p)
        pcol = jnp.asarray(np.kron(eye, pc), dtype=compute_dtype)  # (Bb*d, Bb*Nj_p)
        extra_in = [prow, pcol]
        extra_specs = [pl.BlockSpec(tuple(prow.shape), lambda g: (0, 0)),
                       pl.BlockSpec(tuple(pcol.shape), lambda g: (0, 0))]
        kernel = functools.partial(_cross_attn_pool_kernel,
                                   n_heads=H, e_size=E, d=d)
    else:
        rows, cols = Ni_p, Nj_p
        extra_in, extra_specs = [], []
        kernel = functools.partial(_cross_attn_kernel, n_heads=H, e_size=E)

    out_block = (Bb, rows, 2 * H * cols)
    out_shape = jax.ShapeDtypeStruct((B, rows, 2 * H * cols), out_dtype)
    out_spec = pl.BlockSpec(out_block, lambda g: (g, 0, 0))

    # Explicit VMEM budget: double-buffered blocks + headroom (v7x has only
    # 64 MiB physical / 32 MiB default scoped VMEM).
    blocks = ([((Bb, Ni_p, E), compute_dtype), ((Bb, Nj_p, E), compute_dtype),
               (w_qk.shape, compute_dtype), (b_qk.shape, compute_dtype),
               (out_block, out_dtype)]
              + [(x.shape, compute_dtype) for x in extra_in])
    vmem_limit = int(min(max(2 * sum(_padded_block_bytes(s, dt) for s, dt in blocks)
                             + (8 << 20), 32 << 20), 100 << 20))

    out = pl.pallas_call(
        kernel,
        out_shape=out_shape,
        grid=grid,
        in_specs=[ei_spec, ej_spec, w_spec, b_spec] + extra_specs,
        out_specs=out_spec,
        compiler_params=pltpu.CompilerParams(
            dimension_semantics=("parallel",),
            vmem_limit_bytes=vmem_limit),
    )(ei, ej, w_qk, b_qk, *extra_in)

    # Split the fused lane-packed output and drop node padding.
    packed = out.reshape(B, rows, 2, H, cols)
    if not pooled:
        packed = packed[:, :Ni, :, :, :Nj]
    if packed_output:
        # Fast path: no post-call HBM transpose; layout (B, N_i, H, N_j).
        return packed[:, :, 0], packed[:, :, 1]
    # PyTorch-compatible layout (B, H, N_i, N_j).  NOTE: this transpose is a
    # separate XLA pass over HBM; prefer packed_output=True downstream.
    y = packed.transpose(0, 2, 3, 1, 4)
    return y[:, 0], y[:, 1]


# --------------------------------------------------------------------------
# Pure-JAX reference (mirrors the PyTorch forward exactly, unfused weights)
# --------------------------------------------------------------------------
def reference_forward(e_i, e_j, params, H, E, dataset=None, d=None):
    B = e_i.shape[0]
    scale = float(E) ** (-0.5)

    def proj(x, W, b):
        y = x @ W + b                                        # (B, N, H*E)
        return y.reshape(B, -1, H, E).transpose(0, 2, 1, 3)  # (B, H, N, E)

    q_i = proj(e_i, params["wq"], params["bq"])
    k_i = proj(e_i, params["wk"], params["bk"])
    q_j = proj(e_j, params["wq"], params["bq"])
    k_j = proj(e_j, params["wk"], params["bk"])

    a_i = jnp.einsum("bhie,bhje->bhij", q_i, k_j) * scale
    a_j = jnp.einsum("bhie,bhje->bhij", k_i, q_j) * scale
    if dataset == "IMDBMulti":
        Pr = jnp.asarray(adaptive_pool_matrix(a_i.shape[-2], d))
        Pc = jnp.asarray(adaptive_pool_matrix(a_i.shape[-1], d))
        a_i = jnp.einsum("pi,bhij,qj->bhpq", Pr, a_i, Pc)
        a_j = jnp.einsum("pi,bhij,qj->bhpq", Pr, a_j, Pc)
    return a_i, a_j


# --------------------------------------------------------------------------
if __name__ == "__main__":
    key = jax.random.PRNGKey(0)
    B, H, E, Ni, Nj, D_POOL = 8, 4, 32, 16, 12, 8
    k1, k2, k3, k4, k5, k6 = jax.random.split(key, 6)

    embeddings_i = jax.random.normal(k1, (B, Ni, E), jnp.float32)
    embeddings_j = jax.random.normal(k2, (B, Nj, E), jnp.float32)
    mask_i = jnp.ones((B, Ni), jnp.float32)
    mask_j = jnp.ones((B, Nj), jnp.float32)

    params = {
        "wq": 0.1 * jax.random.normal(k3, (E, H * E), jnp.float32),
        "wk": 0.1 * jax.random.normal(k4, (E, H * E), jnp.float32),
        "bq": 0.1 * jax.random.normal(k5, (H * E,), jnp.float32),
        "bk": 0.1 * jax.random.normal(k6, (H * E,), jnp.float32),
    }

    r_i, r_j = reference_forward(embeddings_i, embeddings_j, params, H, E)
    rp_i, rp_j = reference_forward(embeddings_i, embeddings_j, params, H, E,
                                   dataset="IMDBMulti", d=D_POOL)

    # --- f32 path (exactness check, PyTorch layout) ------------------------
    w32, b32 = prepare_params(params, n_heads=H, embedding_size=E,
                              compute_dtype=jnp.float32)
    fwd_f32 = jax.jit(functools.partial(
        cross_transformer_forward, n_heads=H, embedding_size=E,
        dataset="AIDS700nef", compute_dtype=jnp.float32))
    a_i, a_j = fwd_f32(embeddings_i, mask_i, embeddings_j, mask_j, w32, b32)
    jax.block_until_ready((a_i, a_j))
    np.testing.assert_allclose(np.asarray(a_i), np.asarray(r_i), rtol=1e-3, atol=1e-3)
    np.testing.assert_allclose(np.asarray(a_j), np.asarray(r_j), rtol=1e-3, atol=1e-3)

    # --- IMDBMulti path (pooling hoisted ahead of the projection, exact) ---
    fwd_pool = jax.jit(functools.partial(
        cross_transformer_forward, n_heads=H, embedding_size=E,
        dataset="IMDBMulti", pooling_res=D_POOL, compute_dtype=jnp.float32))
    p_i, p_j = fwd_pool(embeddings_i, mask_i, embeddings_j, mask_j, w32, b32)
    jax.block_until_ready((p_i, p_j))
    np.testing.assert_allclose(np.asarray(p_i), np.asarray(rp_i), rtol=1e-3, atol=1e-3)
    np.testing.assert_allclose(np.asarray(p_j), np.asarray(rp_j), rtol=1e-3, atol=1e-3)

    # --- packed (no post-call transpose) fast path --------------------------
    fwd_packed = jax.jit(functools.partial(
        cross_transformer_forward, n_heads=H, embedding_size=E,
        dataset="AIDS700nef", compute_dtype=jnp.float32, packed_output=True))
    pk_i, pk_j = fwd_packed(embeddings_i, mask_i, embeddings_j, mask_j, w32, b32)
    jax.block_until_ready((pk_i, pk_j))
    np.testing.assert_allclose(np.asarray(pk_i.transpose(0, 2, 1, 3)),
                               np.asarray(r_i), rtol=1e-3, atol=1e-3)
    np.testing.assert_allclose(np.asarray(pk_j.transpose(0, 2, 1, 3)),
                               np.asarray(r_j), rtol=1e-3, atol=1e-3)

    # --- bf16 MXU path (default compute dtype), f32 accumulation -----------
    wbf, bbf = prepare_params(params, n_heads=H, embedding_size=E)  # bf16 default
    fwd_bf16 = jax.jit(functools.partial(
        cross_transformer_forward, n_heads=H, embedding_size=E,
        dataset="AIDS700nef"))
    bf_i, bf_j = fwd_bf16(embeddings_i, mask_i, embeddings_j, mask_j, wbf, bbf)
    jax.block_until_ready((bf_i, bf_j))
    np.testing.assert_allclose(np.asarray(bf_i), np.asarray(r_i), rtol=0.1, atol=0.1)
    np.testing.assert_allclose(np.asarray(bf_j), np.asarray(r_j), rtol=0.1, atol=0.1)

    print("KERNEL_OK")
</pallas_src>

<mosaic_0001>
module attributes {stable_mosaic.version = 11 : i64} {
  func.func @_cross_attn_kernel(%arg0: i32, %arg1: memref<4x16x32xf32, #tpu.memory_space<vmem>>, %arg2: memref<4x16x32xf32, #tpu.memory_space<vmem>>, %arg3: memref<32x256xf32, #tpu.memory_space<vmem>>, %arg4: memref<1x256xf32, #tpu.memory_space<vmem>>, %arg5: memref<4x16x128xf32, #tpu.memory_space<vmem>>) attributes {dimension_semantics = [#tpu.dimension_semantics<parallel>], iteration_bounds = array<i64: 2>, scalar_prefetch = 0 : i64, scratch_operands = 0 : i64, tpu.core_type = #tpu.core_type<tc>, window_params = [{transform_indices = @transform_0, window_bounds = array<i64: 4, 16, 32>}, {transform_indices = @transform_1, window_bounds = array<i64: 4, 16, 32>}, {pipeline_mode = #tpu.pipeline_mode<synchronous>, transform_indices = @transform_2, window_bounds = array<i64: 32, 256>}, {pipeline_mode = #tpu.pipeline_mode<synchronous>, transform_indices = @transform_3, window_bounds = array<i64: 1, 256>}, {transform_indices = @transform_4, window_bounds = array<i64: 4, 16, 128>}]} {
    %c0 = arith.constant 0 : index
    %c0_0 = arith.constant 0 : index
    %0 = vector.load %arg3[%c0, %c0_0] : memref<32x256xf32, #tpu.memory_space<vmem>>, vector<32x256xf32>
    %c0_1 = arith.constant 0 : index
    %c0_2 = arith.constant 0 : index
    %1 = vector.load %arg4[%c0_1, %c0_2] : memref<1x256xf32, #tpu.memory_space<vmem>>, vector<1x256xf32>
    %c0_3 = arith.constant 0 : index
    %c0_4 = arith.constant 0 : index
    %c0_5 = arith.constant 0 : index
    %2 = vector.load %arg1[%c0_3, %c0_4, %c0_5] : memref<4x16x32xf32, #tpu.memory_space<vmem>>, vector<4x16x32xf32>
    %3 = vector.shape_cast %2 : vector<4x16x32xf32> to vector<64x32xf32>
    %cst = arith.constant dense<0.000000e+00> : vector<64x256xf32>
    %4 = tpu.matmul %3, %0, %cst {dimension_numbers = #tpu.dot_dimension_numbers<[1], [0], [0], [1], [0, 0, 1, 1], [], []>} : vector<64x32xf32>, vector<32x256xf32>, vector<64x256xf32> -> vector<64x256xf32>
    %5 = vector.broadcast %1 : vector<1x256xf32> to vector<64x256xf32>
    %6 = arith.addf %4, %5 : vector<64x256xf32>
    %7 = vector.shape_cast %6 : vector<64x256xf32> to vector<4x16x256xf32>
    %c0_6 = arith.constant 0 : index
    %c0_7 = arith.constant 0 : index
    %c0_8 = arith.constant 0 : index
    %8 = vector.load %arg2[%c0_6, %c0_7, %c0_8] : memref<4x16x32xf32, #tpu.memory_space<vmem>>, vector<4x16x32xf32>
    %9 = vector.shape_cast %8 : vector<4x16x32xf32> to vector<64x32xf32>
    %cst_9 = arith.constant dense<0.000000e+00> : vector<64x256xf32>
    %10 = tpu.matmul %9, %0, %cst_9 {dimension_numbers = #tpu.dot_dimension_numbers<[1], [0], [0], [1], [0, 0, 1, 1], [], []>} : vector<64x32xf32>, vector<32x256xf32>, vector<64x256xf32> -> vector<64x256xf32>
    %11 = vector.broadcast %1 : vector<1x256xf32> to vector<64x256xf32>
    %12 = arith.addf %10, %11 : vector<64x256xf32>
    %13 = vector.shape_cast %12 : vector<64x256xf32> to vector<4x16x256xf32>
    %14 = vector.extract_strided_slice %7 {offsets = [0, 0, 0], sizes = [4, 16, 32], strides = [1, 1, 1]} : vector<4x16x256xf32> to vector<4x16x32xf32>
    %15 = vector.extract_strided_slice %7 {offsets = [0, 0, 128], sizes = [4, 16, 32], strides = [1, 1, 1]} : vector<4x16x256xf32> to vector<4x16x32xf32>
    %16 = vector.extract_strided_slice %13 {offsets = [0, 0, 0], sizes = [4, 16, 32], strides = [1, 1, 1]} : vector<4x16x256xf32> to vector<4x16x32xf32>
    %17 = vector.extract_strided_slice %13 {offsets = [0, 0, 128], sizes = [4, 16, 32], strides = [1, 1, 1]} : vector<4x16x256xf32> to vector<4x16x32xf32>
    "tpu.trace_start"() <{level = 10 : i32, message = "bie,bje->bij"}> : () -> ()
    %cst_10 = arith.constant dense<0.000000e+00> : vector<4x16x16xf32>
    %18 = tpu.matmul %14, %17, %cst_10 {dimension_numbers = #tpu.dot_dimension_numbers<[2], [2], [1], [1], [0, 0, 0, 1, 1, 1], [0], [0]>} : vector<4x16x32xf32>, vector<4x16x32xf32>, vector<4x16x16xf32> -> vector<4x16x16xf32>
    %cst_11 = arith.constant dense<0.000000e+00> : vector<4x16x16xf32>
    %19 = tpu.matmul %15, %16, %cst_11 {dimension_numbers = #tpu.dot_dimension_numbers<[2], [2], [1], [1], [0, 0, 0, 1, 1, 1], [0], [0]>} : vector<4x16x32xf32>, vector<4x16x32xf32>, vector<4x16x16xf32> -> vector<4x16x16xf32>
    "tpu.trace_stop"() : () -> ()
    %c0_12 = arith.constant 0 : index
    %c0_13 = arith.constant 0 : index
    %c0_14 = arith.constant 0 : index
    %20 = vector.load %arg5[%c0_12, %c0_13, %c0_14] : memref<4x16x128xf32, #tpu.memory_space<vmem>>, vector<4x16x16xf32>
    tpu.vector_store %arg5[%c0_12, %c0_13, %c0_14], %18 {strides = array<i32>} : memref<4x16x128xf32, #tpu.memory_space<vmem>>, vector<4x16x16xf32>,
    %c0_15 = arith.constant 0 : index
    %c0_16 = arith.constant 0 : index
    %c64 = arith.constant 64 : index
    %21 = vector.load %arg5[%c0_15, %c0_16, %c64] : memref<4x16x128xf32, #tpu.memory_space<vmem>>, vector<4x16x16xf32>
    tpu.vector_store %arg5[%c0_15, %c0_16, %c64], %19 {strides = array<i32>} : memref<4x16x128xf32, #tpu.memory_space<vmem>>, vector<4x16x16xf32>,
    %22 = vector.extract_strided_slice %7 {offsets = [0, 0, 32], sizes = [4, 16, 32], strides = [1, 1, 1]} : vector<4x16x256xf32> to vector<4x16x32xf32>
    %23 = vector.extract_strided_slice %7 {offsets = [0, 0, 160], sizes = [4, 16, 32], strides = [1, 1, 1]} : vector<4x16x256xf32> to vector<4x16x32xf32>
    %24 = vector.extract_strided_slice %13 {offsets = [0, 0, 32], sizes = [4, 16, 32], strides = [1, 1, 1]} : vector<4x16x256xf32> to vector<4x16x32xf32>
    %25 = vector.extract_strided_slice %13 {offsets = [0, 0, 160], sizes = [4, 16, 32], strides = [1, 1, 1]} : vector<4x16x256xf32> to vector<4x16x32xf32>
    "tpu.trace_start"() <{level = 10 : i32, message = "bie,bje->bij"}> : () -> ()
    %cst_17 = arith.constant dense<0.000000e+00> : vector<4x16x16xf32>
    %26 = tpu.matmul %22, %25, %cst_17 {dimension_numbers = #tpu.dot_dimension_numbers<[2], [2], [1], [1], [0, 0, 0, 1, 1, 1], [0], [0]>} : vector<4x16x32xf32>, vector<4x16x32xf32>, vector<4x16x16xf32> -> vector<4x16x16xf32>
    %cst_18 = arith.constant dense<0.000000e+00> : vector<4x16x16xf32>
    %27 = tpu.matmul %23, %24, %cst_18 {dimension_numbers = #tpu.dot_dimension_numbers<[2], [2], [1], [1], [0, 0, 0, 1, 1, 1], [0], [0]>} : vector<4x16x32xf32>, vector<4x16x32xf32>, vector<4x16x16xf32> -> vector<4x16x16xf32>
    "tpu.trace_stop"() : () -> ()
    %c0_19 = arith.constant 0 : index
    %c0_20 = arith.constant 0 : index
    %c16 = arith.constant 16 : index
    %28 = vector.load %arg5[%c0_19, %c0_20, %c16] : memref<4x16x128xf32, #tpu.memory_space<vmem>>, vector<4x16x16xf32>
    tpu.vector_store %arg5[%c0_19, %c0_20, %c16], %26 {strides = array<i32>} : memref<4x16x128xf32, #tpu.memory_space<vmem>>, vector<4x16x16xf32>,
    %c0_21 = arith.constant 0 : index
    %c0_22 = arith.constant 0 : index
    %c80 = arith.constant 80 : index
    %29 = vector.load %arg5[%c0_21, %c0_22, %c80] : memref<4x16x128xf32, #tpu.memory_space<vmem>>, vector<4x16x16xf32>
    tpu.vector_store %arg5[%c0_21, %c0_22, %c80], %27 {strides = array<i32>} : memref<4x16x128xf32, #tpu.memory_space<vmem>>, vector<4x16x16xf32>,
    %30 = vector.extract_strided_slice %7 {offsets = [0, 0, 64], sizes = [4, 16, 32], strides = [1, 1, 1]} : vector<4x16x256xf32> to vector<4x16x32xf32>
    %31 = vector.extract_strided_slice %7 {offsets = [0, 0, 192], sizes = [4, 16, 32], strides = [1, 1, 1]} : vector<4x16x256xf32> to vector<4x16x32xf32>
    %32 = vector.extract_strided_slice %13 {offsets = [0, 0, 64], sizes = [4, 16, 32], strides = [1, 1, 1]} : vector<4x16x256xf32> to vector<4x16x32xf32>
    %33 = vector.extract_strided_slice %13 {offsets = [0, 0, 192], sizes = [4, 16, 32], strides = [1, 1, 1]} : vector<4x16x256xf32> to vector<4x16x32xf32>
    "tpu.trace_start"() <{level = 10 : i32, message = "bie,bje->bij"}> : () -> ()
    %cst_23 = arith.constant dense<0.000000e+00> : vector<4x16x16xf32>
    %34 = tpu.matmul %30, %33, %cst_23 {dimension_numbers = #tpu.dot_dimension_numbers<[2], [2], [1], [1], [0, 0, 0, 1, 1, 1], [0], [0]>} : vector<4x16x32xf32>, vector<4x16x32xf32>, vector<4x16x16xf32> -> vector<4x16x16xf32>
    %cst_24 = arith.constant dense<0.000000e+00> : vector<4x16x16xf32>
    %35 = tpu.matmul %31, %32, %cst_24 {dimension_numbers = #tpu.dot_dimension_numbers<[2], [2], [1], [1], [0, 0, 0, 1, 1, 1], [0], [0]>} : vector<4x16x32xf32>, vector<4x16x32xf32>, vector<4x16x16xf32> -> vector<4x16x16xf32>
    "tpu.trace_stop"() : () -> ()
    %c0_25 = arith.constant 0 : index
    %c0_26 = arith.constant 0 : index
    %c32 = arith.constant 32 : index
    %36 = vector.load %arg5[%c0_25, %c0_26, %c32] : memref<4x16x128xf32, #tpu.memory_space<vmem>>, vector<4x16x16xf32>
    tpu.vector_store %arg5[%c0_25, %c0_26, %c32], %34 {strides = array<i32>} : memref<4x16x128xf32, #tpu.memory_space<vmem>>, vector<4x16x16xf32>,
    %c0_27 = arith.constant 0 : index
    %c0_28 = arith.constant 0 : index
    %c96 = arith.constant 96 : index
    %37 = vector.load %arg5[%c0_27, %c0_28, %c96] : memref<4x16x128xf32, #tpu.memory_space<vmem>>, vector<4x16x16xf32>
    tpu.vector_store %arg5[%c0_27, %c0_28, %c96], %35 {strides = array<i32>} : memref<4x16x128xf32, #tpu.memory_space<vmem>>, vector<4x16x16xf32>,
    %38 = vector.extract_strided_slice %7 {offsets = [0, 0, 96], sizes = [4, 16, 32], strides = [1, 1, 1]} : vector<4x16x256xf32> to vector<4x16x32xf32>
    %39 = vector.extract_strided_slice %7 {offsets = [0, 0, 224], sizes = [4, 16, 32], strides = [1, 1, 1]} : vector<4x16x256xf32> to vector<4x16x32xf32>
    %40 = vector.extract_strided_slice %13 {offsets = [0, 0, 96], sizes = [4, 16, 32], strides = [1, 1, 1]} : vector<4x16x256xf32> to vector<4x16x32xf32>
    %41 = vector.extract_strided_slice %13 {offsets = [0, 0, 224], sizes = [4, 16, 32], strides = [1, 1, 1]} : vector<4x16x256xf32> to vector<4x16x32xf32>
    "tpu.trace_start"() <{level = 10 : i32, message = "bie,bje->bij"}> : () -> ()
    %cst_29 = arith.constant dense<0.000000e+00> : vector<4x16x16xf32>
    %42 = tpu.matmul %38, %41, %cst_29 {dimension_numbers = #tpu.dot_dimension_numbers<[2], [2], [1], [1], [0, 0, 0, 1, 1, 1], [0], [0]>} : vector<4x16x32xf32>, vector<4x16x32xf32>, vector<4x16x16xf32> -> vector<4x16x16xf32>
    %cst_30 = arith.constant dense<0.000000e+00> : vector<4x16x16xf32>
    %43 = tpu.matmul %39, %40, %cst_30 {dimension_numbers = #tpu.dot_dimension_numbers<[2], [2], [1], [1], [0, 0, 0, 1, 1, 1], [0], [0]>} : vector<4x16x32xf32>, vector<4x16x32xf32>, vector<4x16x16xf32> -> vector<4x16x16xf32>
    "tpu.trace_stop"() : () -> ()
    %c0_31 = arith.constant 0 : index
    %c0_32 = arith.constant 0 : index
    %c48 = arith.constant 48 : index
    %44 = vector.load %arg5[%c0_31, %c0_32, %c48] : memref<4x16x128xf32, #tpu.memory_space<vmem>>, vector<4x16x16xf32>
    tpu.vector_store %arg5[%c0_31, %c0_32, %c48], %42 {strides = array<i32>} : memref<4x16x128xf32, #tpu.memory_space<vmem>>, vector<4x16x16xf32>,
    %c0_33 = arith.constant 0 : index
    %c0_34 = arith.constant 0 : index
    %c112 = arith.constant 112 : index
    %45 = vector.load %arg5[%c0_33, %c0_34, %c112] : memref<4x16x128xf32, #tpu.memory_space<vmem>>, vector<4x16x16xf32>
    tpu.vector_store %arg5[%c0_33, %c0_34, %c112], %43 {strides = array<i32>} : memref<4x16x128xf32, #tpu.memory_space<vmem>>, vector<4x16x16xf32>,
    return
  }
  func.func @transform_0(%arg0: i32) -> (i32, i32, i32) {
    %c0_i32 = arith.constant 0 : i32
    %c0_i32_0 = arith.constant 0 : i32
    %c0_i32_1 = arith.constant 0 : i32
    return %arg0, %c0_i32, %c0_i32_0 : i32, i32, i32
  }
  func.func @transform_1(%arg0: i32) -> (i32, i32, i32) {
    %c0_i32 = arith.constant 0 : i32
    %c0_i32_0 = arith.constant 0 : i32
    %c0_i32_1 = arith.constant 0 : i32
    return %arg0, %c0_i32, %c0_i32_0 : i32, i32, i32
  }
  func.func @transform_2(%arg0: i32) -> (i32, i32) {
    %c0_i32 = arith.constant 0 : i32
    %c0_i32_0 = arith.constant 0 : i32
    %c0_i32_1 = arith.constant 0 : i32
    return %c0_i32, %c0_i32_0 : i32, i32
  }
  func.func @transform_3(%arg0: i32) -> (i32, i32) {
    %c0_i32 = arith.constant 0 : i32
    %c0_i32_0 = arith.constant 0 : i32
    %c0_i32_1 = arith.constant 0 : i32
    return %c0_i32, %c0_i32_0 : i32, i32
  }
  func.func @transform_4(%arg0: i32) -> (i32, i32, i32) {
    %c0_i32 = arith.constant 0 : i32
    %c0_i32_0 = arith.constant 0 : i32
    %c0_i32_1 = arith.constant 0 : i32
    return %arg0, %c0_i32, %c0_i32_0 : i32, i32, i32
  }
}

</mosaic_0001>

<bundles_post_ra>
// kernel: cross_transformer_forward.1
= control target key start
LH: loop header
LB: loop body
LE: loop exit
PB: predicated region body
PF: predicated region fallthrough
CT: control target
= control target key end

     0   :  { %s2290_s15 = smov 0   ;;  %s3095_s0 = inlined_call_operand.vmem [shape: f32[8,16,32], index: 0, kind: input, shape index: {}]   ;;  %s3096_s1 = inlined_call_operand.vmem [shape: f32[8,16,32], index: 1, kind: input, shape index: {}]   ;;  %s3097_s2 = inlined_call_operand.vmem [shape: f32[32,256], index: 2, kind: input, shape index: {}]   ;;  %s3098_s3 = inlined_call_operand.vmem [shape: f32[1,256], index: 3, kind: input, shape index: {}]   ;;  %s3099_s4 = inlined_call_operand.vmem [shape: f32[8,16,128], index: 4, kind: output, shape index: {}]  }
   0x1 LB: > { %s2056_s16 = sadd.s32 4294967295, %s2256_s15   ;;  %p2060_p0 = scmp.ge.s32.totalorder %s2256_s15, 1  ;;  %s2256_s15 = sphi %s2290_s15, %s14_s15  }
   0x2   : > { %p176_p1 = scmp.lt.s32.totalorder %s2256_s15, 3 }
   0x4   : > { %p177_p2 = pnand %p2060_p0, %p176_p1 }
   0x5   : > { %s2061_s23 = sshll.u32 (!%p177_p2), %s2056_s16, 2  ;;  %s2258_s18 = smov (!%p177_p2), 96  }
   0x6   : > { %180 = sbr.rel (%p177_p2) target bundleno = 795 (0x31b), region = 36  ;;  %p211_p3 = scmp.lt.s32.totalorder (!%p177_p2), %s2061_s23, 7 }
   0x7   : > { %s2259_s19 = smov (!%p177_p2), 64   ;;  %s2261_s24 = smov (!%p177_p2), 16  }
   0x8   : > { %s2262_s25 = smov (!%p177_p2), 80   ;;  %s2263_s26 = smov (!%p177_p2), 48  }
   0x9   : > { %s2264_s27 = smov (!%p177_p2), 112  }
   0xb   : > { %v237_v0 = vld [vmem:[%s3097_s2 + $0x30] sm:$0xff]  ;;  %v238_v1 = vld [vmem:[%s3097_s2 + $0x38] sm:$0xff]  ;;  %v235_v2 = vld [vmem:[%s3097_s2 + $0x20] sm:$0xff]  ;;  %s3101_s23 = smov (!%p211_p3, %s2061_s23), 7  ;;  %vm253_vm0 = vcmask 261120   ;;  %vm754_vm1 = vcmask 130048  }
   0xc   : > { %290 = vmatpush.msra.mxu0 %v237_v0  ;;  %331 = vmatpush.msra.mxu1 %v238_v1  ;;  %v236_v3 = vld [vmem:[%s3097_s2 + $0x28] sm:$0xff]  ;;  %v233_v4 = vld [vmem:[%s3097_s2 + $0x10] sm:$0xff]  ;;  %v234_v5 = vld [vmem:[%s3097_s2 + $0x18] sm:$0xff]  ;;  %s2322_s8 = sshll.u32 %s3101_s23, 4  ;;  %s2260_s23 = smov 32   ;;  %vm795_vm2 = vcmask 654848  }
   0xd   : > { %445 = vmatpush.msra.mxu3 %v238_v1  ;;  %404 = vmatpush.msra.mxu2 %v237_v0  ;;  %v231_v6 = vld [vmem:[%s3097_s2] sm:$0xff]  ;;  %v232_v7 = vld [vmem:[%s3097_s2 + $0x8] sm:$0xff]  ;;  %s2328_s11 = scalar_lea.vmem %s3095_s0, %s2322_s8  ;;  %s2335_s14 = scalar_lea.vmem %s3096_s1, %s2322_s8  ;;  %vm1148_vm3 = vcmask 261248   ;;  %vm1189_vm4 = vcmask 786048   ;;  %vm1542_vm5 = vcmask 392448   ;;  %vm1583_vm6 = vcmask 917248  }
   0xe   : > { %291 = vmatpush.msra.mxu0 %v235_v2  ;;  %332 = vmatpush.msra.mxu1 %v236_v3  ;;  %v240_v8 = vld [vmem:[%s2328_s11] sm:$0xff]  ;;  %v241_v10 = vld [vmem:[%s2328_s11 + $0x8] sm:$0xff]  ;;  %v242_v12 = vld [vmem:[%s2328_s11 + $0x10] sm:$0xff]  ;;  %s2681_s22 = scalar_lea.vmem %s3099_s4, %s2322_s8  ;;  %vm1936_vm7 = vcmask 523648   ;;  %vm1977_vm8 = vcmask 1048448  }
   0xf   : > { %446 = vmatpush.msra.mxu3 %v236_v3  ;;  %405 = vmatpush.msra.mxu2 %v235_v2  ;;  %v360_v9 = vld [vmem:[%s2335_s14] sm:$0xff]  ;;  %v361_v11 = vld [vmem:[%s2335_s14 + $0x8] sm:$0xff]  ;;  %v362_v13 = vld [vmem:[%s2335_s14 + $0x10] sm:$0xff] }
  0x10   : > { %292 = vmatpush.msra.mxu0 %v233_v4  ;;  %333 = vmatpush.msra.mxu1 %v234_v5  ;;  %v243_v14 = vld [vmem:[%s2328_s11 + $0x18] sm:$0xff]  ;;  %v244_v16 = vld [vmem:[%s2328_s11 + $0x20] sm:$0xff]  ;;  %v245_v18 = vld [vmem:[%s2328_s11 + $0x28] sm:$0xff] }
  0x11   : > { %447 = vmatpush.msra.mxu3 %v234_v5  ;;  %406 = vmatpush.msra.mxu2 %v233_v4  ;;  %v363_v15 = vld [vmem:[%s2335_s14 + $0x18] sm:$0xff]  ;;  %v364_v17 = vld [vmem:[%s2335_s14 + $0x20] sm:$0xff]  ;;  %v365_v19 = vld [vmem:[%s2335_s14 + $0x28] sm:$0xff] }
  0x12   : > { %293 = vmatpush.msra.mxu0 %v231_v6  ;;  %334 = vmatpush.msra.mxu1 %v232_v7  ;;  %v246_v20 = vld [vmem:[%s2328_s11 + $0x30] sm:$0xff]  ;;  %v247_v22 = vld [vmem:[%s2328_s11 + $0x38] sm:$0xff]  ;;  %v239_v24 = vld [vmem:[%s3098_s3] sm:$0x3] }
  0x13   : > { %448 = vmatpush.msra.mxu3 %v232_v7  ;;  %2070 = vmatmul.msk.f32.vlgmr.msra.gmra.mxu0 %vm253_vm0, %v240_v8  ;;  %v366_v21 = vld [vmem:[%s2335_s14 + $0x30] sm:$0xff]  ;;  %v367_v23 = vld [vmem:[%s2335_s14 + $0x38] sm:$0xff]  ;;  %v2387_v25 = vperm.slane %v239_v24, 0  ;;  %v2389_v26 = vperm.slane %v239_v24, 1 }
  0x14   : > { %2078 = vmatmul.msk.f32.vlgmr.msra.gmra.mxu1 %vm253_vm0, %v240_v8  ;;  %2094 = vmatmul.msk.f32.vlgmr.msra.gmra.mxu3 %vm253_vm0, %v360_v9 }
  0x15   : > { %407 = vmatpush.msra.mxu2 %v231_v6 }
  0x16   : > { %2086 = vmatmul.msk.f32.vlgmr.msra.gmra.mxu2 %vm253_vm0, %v360_v9 }
  0x1b   : > { %2071 = vmatmul.msk.f32.gmra.mxu0 %vm253_vm0, %v241_v10 }
  0x1c   : > { %2095 = vmatmul.msk.f32.gmra.mxu3 %vm253_vm0, %v361_v11  ;;  %2079 = vmatmul.msk.f32.gmra.mxu1 %vm253_vm0, %v241_v10 }
  0x1e   : > { %2087 = vmatmul.msk.f32.gmra.mxu2 %vm253_vm0, %v361_v11 }
  0x23   : > { %2072 = vmatmul.msk.f32.gmra.mxu0 %vm253_vm0, %v242_v12 }
  0x24   : > { %2096 = vmatmul.msk.f32.gmra.mxu3 %vm253_vm0, %v362_v13  ;;  %2080 = vmatmul.msk.f32.gmra.mxu1 %vm253_vm0, %v242_v12 }
  0x26   : > { %2088 = vmatmul.msk.f32.gmra.mxu2 %vm253_vm0, %v362_v13 }
  0x2b   : > { %2073 = vmatmul.msk.f32.gmra.mxu0 %vm253_vm0, %v243_v14 }
  0x2c   : > { %2097 = vmatmul.msk.f32.gmra.mxu3 %vm253_vm0, %v363_v15  ;;  %2081 = vmatmul.msk.f32.gmra.mxu1 %vm253_vm0, %v243_v14 }
  0x2e   : > { %2089 = vmatmul.msk.f32.gmra.mxu2 %vm253_vm0, %v363_v15 }
  0x33   : > { %2074 = vmatmul.msk.f32.gmra.mxu0 %vm253_vm0, %v244_v16 }
  0x34   : > { %2098 = vmatmul.msk.f32.gmra.mxu3 %vm253_vm0, %v364_v17  ;;  %2082 = vmatmul.msk.f32.gmra.mxu1 %vm253_vm0, %v244_v16 }
  0x36   : > { %2090 = vmatmul.msk.f32.gmra.mxu2 %vm253_vm0, %v364_v17 }
  0x3b   : > { %2075 = vmatmul.msk.f32.gmra.mxu0 %vm253_vm0, %v245_v18 }
  0x3c   : > { %2099 = vmatmul.msk.f32.gmra.mxu3 %vm253_vm0, %v365_v19  ;;  %2083 = vmatmul.msk.f32.gmra.mxu1 %vm253_vm0, %v245_v18 }
  0x3e   : > { %2091 = vmatmul.msk.f32.gmra.mxu2 %vm253_vm0, %v365_v19 }
  0x43   : > { %2076 = vmatmul.msk.f32.gmra.mxu0 %vm253_vm0, %v246_v20 }
  0x44   : > { %2100 = vmatmul.msk.f32.gmra.mxu3 %vm253_vm0, %v366_v21  ;;  %2084 = vmatmul.msk.f32.gmra.mxu1 %vm253_vm0, %v246_v20 }
  0x46   : > { %2092 = vmatmul.msk.f32.gmra.mxu2 %vm253_vm0, %v366_v21 }
  0x4b   : > { %2077 = vmatmul.msk.f32.gmra.mxu0 %vm253_vm0, %v247_v22 }
  0x4c   : > { %2101 = vmatmul.msk.f32.gmra.mxu3 %vm253_vm0, %v367_v23  ;;  %2085 = vmatmul.msk.f32.gmra.mxu1 %vm253_vm0, %v247_v22 }
  0x4e   : > { %2093 = vmatmul.msk.f32.gmra.mxu2 %vm253_vm0, %v367_v23 }
  0x90   : > { %v295_v27 = vpop.f32.mrf.mxu0 }
  0x91   : > { %v2392_v28 = vadd.f32 %v295_v27, %v2387_v25  ;;  %v336_v29 = vpop.f32.mrf.mxu1 }
  0x92   : > { %v2395_v30 = vadd.f32 %v336_v29, %v2389_v26 }
  0x93   : > { %804 = vrot.lane.b32.xlu2 %v2392_v28, %s2258_s18 }
  0x94   : > { %1354 = vrot.lane.b32.xlu1 %v2395_v30, %s2259_s19  ;;  %960 = vrot.lane.b32.xlu0 %v2395_v30, %s2258_s18 }
  0x97   : > { %v450_v31 = vpop.f32.mrf.mxu3 }
  0x98   : > { %v2404_v32 = vadd.f32 %v450_v31, %v2389_v26  ;;  %v298_v33 = vpop.f32.mrf.mxu0 }
  0x99   : > { %v2407_v34 = vadd.f32 %v298_v33, %v2387_v25  ;;  %v409_v35 = vpop.f32.mrf.mxu2  ;;  %v339_v43 = vpop.f32.mrf.mxu1 }
  0x9a   : > { %v2416_v36 = vadd.f32 %v409_v35, %v2387_v25  ;;  %v2453_v48 = vadd.f32 %v339_v43, %v2389_v26 }
  0x9b   : > { %1198 = vrot.lane.b32.xlu2 %v2392_v28, %s2259_s19 }
  0x9c   : > { %808 = vrot.lane.b32.xlu1 %v2404_v32, %s2258_s18  ;;  %806 = vrot.lane.b32.xlu0 %v2407_v34, %s2258_s18 }
  0x9f   : > { %v453_v37 = vpop.f32.mrf.mxu3 }
  0xa0   : > { %v2419_v38 = vadd.f32 %v453_v37, %v2389_v26  ;;  %v301_v44 = vpop.f32.mrf.mxu0 }
  0xa1   : > { %v412_v39 = vpop.f32.mrf.mxu2  ;;  %v2450_v47 = vadd.f32 %v301_v44, %v2387_v25  ;;  %v342_v52 = vpop.f32.mrf.mxu1 }
  0xa2   : > { %2102 = vmatpush.xpose.msk.msrb.mxu0 %vm253_vm0, %v2419_v38  ;;  %v2424_v40 = vadd.f32 %v412_v39, %v2387_v25  ;;  %v2479_v55 = vadd.f32 %v342_v52, %v2389_v26 }
  0xa3   : > { %964 = vrot.lane.b32.xlu2 %v2416_v36, %s2258_s18 }
  0xa4   : > { %1202 = vrot.lane.b32.xlu1 %v2404_v32, %s2259_s19  ;;  %1200 = vrot.lane.b32.xlu0 %v2407_v34, %s2259_s19 }
  0xa6   : > { %2103 = vmatpush.xpose.msk.msrb.mxu0 %vm253_vm0, %v2404_v32 }
  0xa7   : > { %v456_v41 = vpop.f32.mrf.mxu3 }
  0xa8   : > { %v2458_v50 = vadd.f32 %v456_v41, %v2389_v26  ;;  %v304_v56 = vpop.f32.mrf.mxu0 }
  0xa9   : > { %2104 = vmatmul.msk.f32.vlgmr.msrb.gmra.mxu0 %vm253_vm0, %v2392_v28  ;;  %v415_v42 = vpop.f32.mrf.mxu2  ;;  %v2494_v58 = vadd.f32 %v304_v56, %v2387_v25  ;;  %v345_v3 = vpop.f32.mrf.mxu1 }
  0xaa   : > { %2118 = vmatpush.xpose.msk.msra.mxu0 %vm253_vm0, %v2424_v40  ;;  %v2474_v53 = vadd.f32 %v415_v42, %v2387_v25  ;;  %v2543_v7 = vadd.f32 %v345_v3, %v2389_v26 }
  0xab   : > { %810 = vrot.lane.b32.xlu2 %v2419_v38, %s2258_s18 }
  0xac   : > { %1358 = vrot.lane.b32.xlu1 %v2416_v36, %s2259_s19  ;;  %966 = vrot.lane.b32.xlu0 %v2424_v40, %s2258_s18 }
  0xae   : > { %2119 = vmatpush.xpose.msk.msra.mxu0 %vm253_vm0, %v2416_v36 }
  0xaf   : > { %v459_v45 = vpop.f32.mrf.mxu3 }
  0xb0   : > { %v2447_v46 = vadd.f32 %v459_v45, %v2389_v26  ;;  %v307_v61 = vpop.f32.mrf.mxu0 }
  0xb1   : > { %2105 = vmatmul.msk.f32.gmra.mxu0 %vm253_vm0, %v2407_v34  ;;  %v418_v49 = vpop.f32.mrf.mxu2  ;;  %v2518_v1 = vadd.f32 %v307_v61, %v2387_v25  ;;  %v348_v8 = vpop.f32.mrf.mxu1 }
  0xb2   : > { %2106 = vmatpush.xpose.msk.msrb.mxu1 %vm253_vm0, %v2447_v46  ;;  %v2465_v51 = vadd.f32 %v418_v49, %v2387_v25  ;;  %v2556_v10 = vadd.f32 %v348_v8, %v2389_v26 }
  0xb3   : > { %1204 = vrot.lane.b32.xlu2 %v2419_v38, %s2259_s19 }
  0xb4   : > { %962 = vrot.lane.b32.xlu1 %v2453_v48, %s2258_s18  ;;  %843 = vrot.lane.b32.xlu0 %v2450_v47, %s2258_s18 }
  0xb6   : > { %2107 = vmatpush.xpose.msk.msrb.mxu1 %vm253_vm0, %v2458_v50 }
  0xb7   : > { %v462_v54 = vpop.f32.mrf.mxu3 }
  0xb8   : > { %v2504_v63 = vadd.f32 %v462_v54, %v2389_v26  ;;  %v310_v4 = vpop.f32.mrf.mxu0 }
  0xb9   : > { %2108 = vmatmul.msk.f32.vlgmr.msrb.gmra.mxu1 %vm253_vm0, %v2450_v47  ;;  %2120 = vmatmul.msk.f32.vlgmr.msra.gmra.mxu0 %vm253_vm0, %v2395_v30  ;;  %v421_v57 = vpop.f32.mrf.mxu2  ;;  %v2540_v6 = vadd.f32 %v310_v4, %v2387_v25  ;;  %v351_v16 = vpop.f32.mrf.mxu1 }
  0xba   : > { %2122 = vmatpush.xpose.msk.msra.mxu1 %vm253_vm0, %v2465_v51  ;;  %v2523_v2 = vadd.f32 %v421_v57, %v2387_v25  ;;  %v2580_v17 = vadd.f32 %v351_v16, %v2389_v26 }
  0xbb   : > { %1360 = vrot.lane.b32.xlu2 %v2424_v40, %s2259_s19 }
  0xbc   : > { %999 = vrot.lane.b32.xlu1 %v2479_v55, %s2258_s18  ;;  %1237 = vrot.lane.b32.xlu0 %v2450_v47, %s2259_s19 }
  0xbe   : > { %2123 = vmatpush.xpose.msk.msra.mxu1 %vm253_vm0, %v2474_v53 }
  0xbf   : > { %v465_v59 = vpop.f32.mrf.mxu3 }
  0xc0   : > { %v2497_v60 = vadd.f32 %v465_v59, %v2389_v26  ;;  %v313_v13 = vpop.f32.mrf.mxu0 }
  0xc1   : > { %2109 = vmatmul.msk.f32.gmra.mxu1 %vm253_vm0, %v2494_v58  ;;  %2121 = vmatmul.msk.f32.gmra.mxu0 %vm253_vm0, %v2453_v48  ;;  %v424_v62 = vpop.f32.mrf.mxu2  ;;  %v2577_v15 = vadd.f32 %v313_v13, %v2387_v25  ;;  %v354_v23 = vpop.f32.mrf.mxu1 }
  0xc2   : > { %2110 = vmatpush.xpose.msk.msrb.mxu2 %vm253_vm0, %v2497_v60  ;;  %v2511_v0 = vadd.f32 %v424_v62, %v2387_v25  ;;  %v2614_v27 = vadd.f32 %v354_v23, %v2389_v26 }
  0xc3   : > { %1393 = vrot.lane.b32.xlu2 %v2479_v55, %s2259_s19 }
  0xc4   : > { %845 = vrot.lane.b32.xlu1 %v2494_v58, %s2258_s18  ;;  %1003 = vrot.lane.b32.xlu0 %v2474_v53, %s2258_s18 }
  0xc6   : > { %2111 = vmatpush.xpose.msk.msrb.mxu2 %vm253_vm0, %v2504_v63 }
  0xc7   : > { %v468_v5 = vpop.f32.mrf.mxu3 }
  0xc8   : > { %v2562_v12 = vadd.f32 %v468_v5, %v2389_v26  ;;  %v316_v18 = vpop.f32.mrf.mxu0 }
  0xc9   : > { %2124 = vmatmul.msk.f32.vlgmr.msra.gmra.mxu1 %vm253_vm0, %v2479_v55  ;;  %2112 = vmatmul.msk.f32.vlgmr.msrb.gmra.mxu2 %vm253_vm0, %v2518_v1  ;;  %v427_v14 = vpop.f32.mrf.mxu2  ;;  %v2593_v20 = vadd.f32 %v316_v18, %v2387_v25 }
  0xca   : > { %2126 = vmatpush.xpose.msk.msra.mxu2 %vm253_vm0, %v2511_v0  ;;  %v2603_v22 = vadd.f32 %v427_v14, %v2387_v25 }
  0xcb   : > { %847 = vrot.lane.b32.xlu2 %v2458_v50, %s2258_s18 }
  0xcc   : > { %1239 = vrot.lane.b32.xlu1 %v2494_v58, %s2259_s19  ;;  %1397 = vrot.lane.b32.xlu0 %v2474_v53, %s2259_s19 }
  0xce   : > { %2127 = vmatpush.xpose.msk.msra.mxu2 %vm253_vm0, %v2523_v2 }
  0xcf   : > { %v471_v9 = vpop.f32.mrf.mxu3 }
  0xd0   : > { %v2559_v11 = vadd.f32 %v471_v9, %v2389_v26 }
  0xd1   : > { %2113 = vmatmul.msk.f32.gmra.mxu2 %vm253_vm0, %v2540_v6  ;;  %2125 = vmatmul.msk.f32.gmra.mxu1 %vm253_vm0, %v2543_v7  ;;  %v430_v19 = vpop.f32.mrf.mxu2 }
  0xd2   : > { %2114 = vmatpush.xpose.msk.msrb.mxu3 %vm253_vm0, %v2559_v11  ;;  %v2596_v21 = vadd.f32 %v430_v19, %v2387_v25  ;;  %v357_v25 = vpop.f32.mrf.mxu1 }
  0xd3   : > { %1241 = vrot.lane.b32.xlu2 %v2458_v50, %s2259_s19  ;;  %v2627_v31 = vadd.f32 %v357_v25, %v2389_v26 }
  0xd4   : > { %1005 = vrot.lane.b32.xlu1 %v2465_v51, %s2258_s18  ;;  %849 = vrot.lane.b32.xlu0 %v2447_v46, %s2258_s18 }
  0xd6   : > { %2115 = vmatpush.xpose.msk.msrb.mxu3 %vm253_vm0, %v2562_v12 }
  0xd9   : > { %2128 = vmatmul.msk.f32.vlgmr.msra.gmra.mxu2 %vm253_vm0, %v2556_v10  ;;  %2116 = vmatmul.msk.f32.vlgmr.msrb.gmra.mxu3 %vm253_vm0, %v2577_v15 }
  0xda   : > { %2130 = vmatpush.xpose.msk.msra.mxu3 %vm253_vm0, %v2596_v21 }
  0xdb   : > { %1001 = vrot.lane.b32.xlu2 %v2543_v7, %s2258_s18 }
  0xdc   : > { %1243 = vrot.lane.b32.xlu1 %v2447_v46, %s2259_s19  ;;  %1276 = vrot.lane.b32.xlu0 %v2518_v1, %s2259_s19 }
  0xde   : > { %2131 = vmatpush.xpose.msk.msra.mxu3 %vm253_vm0, %v2603_v22 }
  0xe1   : > { %2129 = vmatmul.msk.f32.gmra.mxu2 %vm253_vm0, %v2580_v17  ;;  %2117 = vmatmul.msk.f32.gmra.mxu3 %vm253_vm0, %v2593_v20 }
  0xe3   : > { %1038 = vrot.lane.b32.xlu2 %v2556_v10, %s2258_s18 }
  0xe4   : > { %1399 = vrot.lane.b32.xlu1 %v2465_v51, %s2259_s19  ;;  %1432 = vrot.lane.b32.xlu0 %v2556_v10, %s2259_s19 }
  0xe9   : > { %2132 = vmatmul.msk.f32.vlgmr.msra.gmra.mxu3 %vm253_vm0, %v2614_v27 }
  0xeb   : > { %884 = vrot.lane.b32.xlu2 %v2540_v6, %s2258_s18 }
  0xec   : > { %882 = vrot.lane.b32.xlu1 %v2518_v1, %s2258_s18  ;;  %886 = vrot.lane.b32.xlu0 %v2504_v63, %s2258_s18 }
  0xed   : > { %v805_v24 = vpop.permute.xlu2 %804 }
  0xf1   : > { %2133 = vmatmul.msk.f32.gmra.mxu3 %vm253_vm0, %v2627_v31 }
  0xf3   : > { %1044 = vrot.lane.b32.xlu2 %v2511_v0, %s2258_s18 }
  0xf4   : > { %1042 = vrot.lane.b32.xlu1 %v2523_v2, %s2258_s18  ;;  %1280 = vrot.lane.b32.xlu0 %v2504_v63, %s2259_s19 }
  0xf5   : > { %v2624_v29 = vpop.permute.xlu2 %1198 }
  0xfb   : > { %1438 = vrot.lane.b32.xlu2 %v2511_v0, %s2259_s19 }
  0xfc   : > { %888 = vrot.lane.b32.xlu1 %v2497_v60, %s2258_s18  ;;  %1436 = vrot.lane.b32.xlu0 %v2523_v2, %s2259_s19 }
  0xfd   : > { %v965_v33 = vpop.permute.xlu2 %964 }
 0x103   : > { %921 = vrot.lane.b32.xlu2 %v2577_v15, %s2258_s18 }
 0x104   : > { %1282 = vrot.lane.b32.xlu1 %v2497_v60, %s2259_s19  ;;  %1040 = vrot.lane.b32.xlu0 %v2580_v17, %s2258_s18 }
 0x105   : > { %v811_v26 = vpop.permute.xlu2 %810 }
 0x106   : > { %v2643_v35 = vpop.permute.xlu1 %1354  ;;  %v961_v37 = vpop.permute.xlu0 %960  ;;  %2134 = vmatpush.xpose.msk.msrb.mxu0 %vm253_vm0, %v811_v26 }
 0x10b   : > { %1471 = vrot.lane.b32.xlu2 %v2614_v27, %s2259_s19 }
 0x10c   : > { %1315 = vrot.lane.b32.xlu1 %v2577_v15, %s2259_s19  ;;  %1278 = vrot.lane.b32.xlu0 %v2540_v6, %s2259_s19 }
 0x10d   : > { %v1205_v39 = vpop.permute.xlu2 %1204 }
 0x10e   : > { %v809_v41 = vpop.permute.xlu1 %808  ;;  %v807_v42 = vpop.permute.xlu0 %806 }
 0x10f   : > { %2135 = vmatpush.xpose.msk.msrb.mxu0 %vm253_vm0, %v809_v41 }
 0x112   : > { %2136 = vmatmul.msk.f32.vlgmr.msrb.gmra.mxu0 %vm253_vm0, %v805_v24 }
 0x113   : > { %1081 = vrot.lane.b32.xlu2 %v2603_v22, %s2258_s18 }
 0x114   : > { %925 = vrot.lane.b32.xlu1 %v2562_v12, %s2258_s18  ;;  %1434 = vrot.lane.b32.xlu0 %v2580_v17, %s2259_s19 }
 0x115   : > { %v1361_v43 = vpop.permute.xlu2 %1360 }
 0x116   : > { %v1203_v44 = vpop.permute.xlu1 %1202  ;;  %v1201_v45 = vpop.permute.xlu0 %1200 }
 0x11a   : > { %2137 = vmatmul.msk.f32.gmra.mxu0 %vm253_vm0, %v807_v42 }
 0x11b   : > { %1319 = vrot.lane.b32.xlu2 %v2562_v12, %s2259_s19 }
 0x11c   : > { %1079 = vrot.lane.b32.xlu1 %v2627_v31, %s2258_s18  ;;  %1077 = vrot.lane.b32.xlu0 %v2614_v27, %s2258_s18 }
 0x11d   : > { %v2667_v49 = vpop.permute.xlu2 %1393 }
 0x11e   : > { %v1359_v52 = vpop.permute.xlu1 %1358  ;;  %v967_v54 = vpop.permute.xlu0 %966 }
 0x11f   : > { %2150 = vmatpush.xpose.msk.msra.mxu0 %vm253_vm0, %v967_v54 }
 0x123   : > { %2151 = vmatpush.xpose.msk.msra.mxu0 %vm253_vm0, %v965_v33  ;;  %1475 = vrot.lane.b32.xlu2 %v2603_v22, %s2259_s19 }
 0x124   : > { %1317 = vrot.lane.b32.xlu1 %v2593_v20, %s2259_s19  ;;  %923 = vrot.lane.b32.xlu0 %v2593_v20, %s2258_s18 }
 0x125   : > { %v848_v56 = vpop.permute.xlu2 %847 }
 0x126   : > { %v963_v57 = vpop.permute.xlu1 %962  ;;  %v844_v59 = vpop.permute.xlu0 %843  ;;  %2152 = vmatmul.msk.f32.vlgmr.msra.gmra.mxu0 %vm253_vm0, %v961_v37 }
 0x127   : > { %2166 = vmatpush.xpose.msk.msrb.mxu0 %vm253_vm0, %v1205_v39  ;;  %v503_v61 = vpop.f32.mrf.mxu0 }
 0x128   : > { %755 = vst.msk [vmem:[%s2681_s22] sm:$0xff] %vm754_vm1, %v503_v61 }
 0x12b   : > { %2167 = vmatpush.xpose.msk.msrb.mxu0 %vm253_vm0, %v1203_v44  ;;  %927 = vrot.lane.b32.xlu2 %v2559_v11, %s2258_s18 }
 0x12c   : > { %1473 = vrot.lane.b32.xlu1 %v2627_v31, %s2259_s19  ;;  %1598 = vrot.lane.b32.xlu0 %v2419_v38, %s2260_s23 }
 0x12d   : > { %v1242_v62 = vpop.permute.xlu2 %1241 }
 0x12e   : > { %v1000_v3 = vpop.permute.xlu1 %999  ;;  %v2696_v4 = vpop.permute.xlu0 %1237  ;;  %2153 = vmatmul.msk.f32.gmra.mxu0 %vm253_vm0, %v963_v57 }
 0x12f   : > { %2182 = vmatpush.xpose.msk.msra.mxu0 %vm253_vm0, %v1361_v43  ;;  %v506_v5 = vpop.f32.mrf.mxu0 }
 0x130   : > { %756 = vst.msk [vmem:[%s2681_s22 + $0x8] sm:$0xff] %vm754_vm1, %v506_v5 }
 0x133   : > { %2183 = vmatpush.xpose.msk.msra.mxu0 %vm253_vm0, %v1359_v52  ;;  %1676 = vrot.lane.b32.xlu2 %v2497_v60, %s2260_s23 }
 0x134   : > { %1356 = vrot.lane.b32.xlu1 %v2453_v48, %s2259_s19  ;;  %1713 = vrot.lane.b32.xlu0 %v2562_v12, %s2260_s23 }
 0x135   : > { %v2707_v38 = vpop.permute.xlu2 %1001 }
 0x136   : > { %v846_v8 = vpop.permute.xlu1 %845  ;;  %v538_v9 = vpop.f32.mrf.mxu1  ;;  %2168 = vmatmul.msk.f32.vlgmr.msrb.gmra.mxu0 %vm253_vm0, %v2624_v29 }
 0x137   : > { %757 = vst.msk [vmem:[%s2681_s22 + $0x10] sm:$0xff] %vm754_vm1, %v538_v9  ;;  %v1004_v13 = vpop.permute.xlu0 %1003 }
 0x13b   : > { %1395 = vrot.lane.b32.xlu2 %v2543_v7, %s2259_s19 }
 0x13c   : > { %1674 = vrot.lane.b32.xlu1 %v2504_v63, %s2260_s23  ;;  %1083 = vrot.lane.b32.xlu0 %v2596_v21, %s2258_s18 }
 0x13d   : > { %v2719_v60 = vpop.permute.xlu2 %1038 }
 0x13e   : > { %v2721_v12 = vpop.permute.xlu1 %1239  ;;  %v541_v14 = vpop.f32.mrf.mxu1  ;;  %2169 = vmatmul.msk.f32.gmra.mxu0 %vm253_vm0, %v1201_v45 }
 0x13f   : > { %758 = vst.msk [vmem:[%s2681_s22 + $0x18] sm:$0xff] %vm754_vm1, %v541_v14  ;;  %v1398_v16 = vpop.permute.xlu0 %1397 }
 0x143   : > { %1637 = vrot.lane.b32.xlu2 %v2447_v46, %s2260_s23 }
 0x144   : > { %1670 = vrot.lane.b32.xlu1 %v2518_v1, %s2260_s23  ;;  %1477 = vrot.lane.b32.xlu0 %v2596_v21, %s2259_s19 }
 0x145   : > { %v2732_v63 = vpop.permute.xlu2 %884 }
 0x146   : > { %v1006_v18 = vpop.permute.xlu1 %1005  ;;  %2184 = vmatmul.msk.f32.vlgmr.msra.gmra.mxu0 %vm253_vm0, %v2643_v35 }
 0x147   : > { %v850_v19 = vpop.permute.xlu0 %849 }
 0x148   : > { %2138 = vmatpush.xpose.msk.msrb.mxu1 %vm253_vm0, %v850_v19 }
 0x14b   : > { %1321 = vrot.lane.b32.xlu2 %v2559_v11, %s2259_s19 }
 0x14c   : > { %2139 = vmatpush.xpose.msk.msrb.mxu1 %vm253_vm0, %v848_v56  ;;  %1635 = vrot.lane.b32.xlu1 %v2458_v50, %s2260_s23  ;;  %v573_v46 = vpop.f32.mrf.mxu2 }
 0x14d   : > { %1715 = vrot.lane.b32.xlu0 %v2559_v11, %s2260_s23  ;;  %v1045_v1 = vpop.permute.xlu2 %1044  ;;  %759 = vst.msk [vmem:[%s2681_s22 + $0x20] sm:$0xff] %vm754_vm1, %v573_v46 }
 0x14e   : > { %v1244_v23 = vpop.permute.xlu1 %1243 }
 0x14f   : > { %v2747_v24 = vpop.permute.xlu0 %1276  ;;  %2140 = vmatmul.msk.f32.vlgmr.msrb.gmra.mxu1 %vm253_vm0, %v844_v59 }
 0x150   : > { %2154 = vmatpush.xpose.msk.msra.mxu1 %vm253_vm0, %v1006_v18 }
 0x153   : > { %1596 = vrot.lane.b32.xlu2 %v2404_v32, %s2260_s23 }
 0x154   : > { %2155 = vmatpush.xpose.msk.msra.mxu1 %vm253_vm0, %v1004_v13  ;;  %1672 = vrot.lane.b32.xlu1 %v2540_v6, %s2260_s23  ;;  %v576_v50 = vpop.f32.mrf.mxu2 }
 0x155   : > { %1709 = vrot.lane.b32.xlu0 %v2577_v15, %s2260_s23  ;;  %v2758_v11 = vpop.permute.xlu2 %1438  ;;  %760 = vst.msk [vmem:[%s2681_s22 + $0x28] sm:$0xff] %vm754_vm1, %v576_v50 }
 0x156   : > { %v1400_v25 = vpop.permute.xlu1 %1399 }
 0x157   : > { %v2763_v29 = vpop.permute.xlu0 %1432  ;;  %2141 = vmatmul.msk.f32.gmra.mxu1 %vm253_vm0, %v846_v8 }
 0x158   : > { %2170 = vmatpush.xpose.msk.msrb.mxu1 %vm253_vm0, %v1244_v23 }
 0x15b   : > { %1592 = vrot.lane.b32.xlu2 %v2392_v28, %s2260_s23 }
 0x15c   : > { %2171 = vmatpush.xpose.msk.msrb.mxu1 %vm253_vm0, %v1242_v62  ;;  %1871 = vrot.lane.b32.xlu1 %v2596_v21, %s2260_s23  ;;  %v608_v33 = vpop.f32.mrf.mxu3 }
 0x15d   : > { %1631 = vrot.lane.b32.xlu0 %v2450_v47, %s2260_s23  ;;  %v922_v32 = vpop.permute.xlu2 %921  ;;  %761 = vst.msk [vmem:[%s2681_s22 + $0x30] sm:$0xff] %vm754_vm1, %v608_v33 }
 0x15e   : > { %v883_v6 = vpop.permute.xlu1 %882 }
 0x15f   : > { %v887_v15 = vpop.permute.xlu0 %886  ;;  %2156 = vmatmul.msk.f32.vlgmr.msra.gmra.mxu1 %vm253_vm0, %v1000_v3 }
 0x160   : > { %2186 = vmatpush.xpose.msk.msra.mxu1 %vm253_vm0, %v1400_v25 }
 0x163   : > { %1711 = vrot.lane.b32.xlu2 %v2593_v20, %s2260_s23 }
 0x164   : > { %2187 = vmatpush.xpose.msk.msra.mxu1 %vm253_vm0, %v1398_v16  ;;  %1754 = vrot.lane.b32.xlu1 %v2424_v40, %s2260_s23  ;;  %v611_v20 = vpop.f32.mrf.mxu3 }
 0x165   : > { %1832 = vrot.lane.b32.xlu0 %v2511_v0, %s2260_s23  ;;  %v2783_v28 = vpop.permute.xlu2 %1471  ;;  %762 = vst.msk [vmem:[%s2681_s22 + $0x38] sm:$0xff] %vm754_vm1, %v611_v20 }
 0x166   : > { %v1043_v47 = vpop.permute.xlu1 %1042 }
 0x167   : > { %v1281_v21 = vpop.permute.xlu0 %1280  ;;  %2157 = vmatmul.msk.f32.gmra.mxu1 %vm253_vm0, %v2707_v38 }
 0x16b   : > { %1594 = vrot.lane.b32.xlu2 %v2407_v34, %s2260_s23 }
 0x16c   : > { %1869 = vrot.lane.b32.xlu1 %v2603_v22, %s2260_s23  ;;  %v748_v39 = vpop.f32.mrf.mxu3 }
 0x16d   : > { %1633 = vrot.lane.b32.xlu0 %v2494_v58, %s2260_s23  ;;  %v2795_v40 = vpop.permute.xlu2 %1081 }
 0x16e   : > { %v889_v0 = vpop.permute.xlu1 %888 }
 0x16f   : > { %v1437_v26 = vpop.permute.xlu0 %1436  ;;  %2172 = vmatmul.msk.f32.vlgmr.msrb.gmra.mxu1 %vm253_vm0, %v2696_v4  ;;  %2142 = vmatpush.xpose.msk.msrb.mxu2 %vm253_vm0, %v889_v0 }
 0x173   : > { %2143 = vmatpush.xpose.msk.msrb.mxu2 %vm253_vm0, %v887_v15  ;;  %1830 = vrot.lane.b32.xlu2 %v2523_v2, %s2260_s23 }
 0x174   : > { %1865 = vrot.lane.b32.xlu1 %v2614_v27, %s2260_s23  ;;  %v751_v44 = vpop.f32.mrf.mxu3 }
 0x175   : > { %1793 = vrot.lane.b32.xlu0 %v2465_v51, %s2260_s23  ;;  %v2808_v34 = vpop.permute.xlu2 %1319 }
 0x176   : > { %v1283_v58 = vpop.permute.xlu1 %1282  ;;  %2144 = vmatmul.msk.f32.vlgmr.msrb.gmra.mxu2 %vm253_vm0, %v883_v6 }
 0x177   : > { %2158 = vmatpush.xpose.msk.msra.mxu2 %vm253_vm0, %v1045_v1  ;;  %v1041_v22 = vpop.permute.xlu0 %1040  ;;  %2173 = vmatmul.msk.f32.gmra.mxu1 %vm253_vm0, %v2721_v12 }
 0x17b   : > { %2159 = vmatpush.xpose.msk.msra.mxu2 %vm253_vm0, %v1043_v47  ;;  %1826 = vrot.lane.b32.xlu2 %v2556_v10, %s2260_s23 }
 0x17c   : > { %1787 = vrot.lane.b32.xlu1 %v2479_v55, %s2260_s23 }
 0x17d   : > { %1752 = vrot.lane.b32.xlu0 %v2416_v36, %s2260_s23  ;;  %v2822_v51 = vpop.permute.xlu2 %1475 }
 0x17e   : > { %v2824_v2 = vpop.permute.xlu1 %1315  ;;  %2145 = vmatmul.msk.f32.gmra.mxu2 %vm253_vm0, %v2732_v63 }
 0x17f   : > { %2174 = vmatpush.xpose.msk.msrb.mxu2 %vm253_vm0, %v1283_v58  ;;  %v1279_v27 = vpop.permute.xlu0 %1278  ;;  %2188 = vmatmul.msk.f32.vlgmr.msra.gmra.mxu1 %vm253_vm0, %v2667_v49 }
 0x183   : > { %2175 = vmatpush.xpose.msk.msrb.mxu2 %vm253_vm0, %v1281_v21  ;;  %1791 = vrot.lane.b32.xlu2 %v2474_v53, %s2260_s23  ;;  %v678_v53 = vpop.f32.mrf.mxu1 }
 0x184   : > { %1750 = vrot.lane.b32.xlu1 %v2453_v48, %s2260_s23  ;;  %v643_v48 = vpop.f32.mrf.mxu0 }
 0x185   : > { %1748 = vrot.lane.b32.xlu0 %v2395_v30, %s2260_s23  ;;  %v928_v36 = vpop.permute.xlu2 %927 }
 0x186   : > { %v926_v55 = vpop.permute.xlu1 %925  ;;  %2160 = vmatmul.msk.f32.vlgmr.msra.gmra.mxu2 %vm253_vm0, %v2719_v60  ;;  %2146 = vmatpush.xpose.msk.msrb.mxu3 %vm253_vm0, %v928_v36 }
 0x187   : > { %v1435_v10 = vpop.permute.xlu0 %1434  ;;  %2190 = vmatpush.xpose.msk.msra.mxu2 %vm253_vm0, %v2758_v11 }
 0x18a   : > { %2147 = vmatpush.xpose.msk.msrb.mxu3 %vm253_vm0, %v926_v55 }
 0x18b   : > { %2191 = vmatpush.xpose.msk.msra.mxu2 %vm253_vm0, %v1437_v26  ;;  %1828 = vrot.lane.b32.xlu2 %v2580_v17, %s2260_s23  ;;  %v681_v41 = vpop.f32.mrf.mxu1 }
 0x18c   : > { %775 = vrot.lane.b32.xlu1 %v678_v53, %s2259_s19  ;;  %v646_v43 = vpop.f32.mrf.mxu0 }
 0x18d   : > { %1867 = vrot.lane.b32.xlu0 %v2627_v31, %s2260_s23  ;;  %2148 = vmatmul.msk.f32.vlgmr.msrb.gmra.mxu3 %vm253_vm0, %v922_v32  ;;  %v1677_v30 = vpop.permute.xlu2 %1676 }
 0x18e   : > { %v1080_v35 = vpop.permute.xlu1 %1079  ;;  %2161 = vmatmul.msk.f32.gmra.mxu2 %vm253_vm0, %v1041_v22 }
 0x18f   : > { %v1078_v37 = vpop.permute.xlu0 %1077 }
 0x193   : > { %1789 = vrot.lane.b32.xlu2 %v2543_v7, %s2260_s23  ;;  %v713_v7 = vpop.f32.mrf.mxu2 }
 0x194   : > { %777 = vrot.lane.b32.xlu1 %v681_v41, %s2259_s19  ;;  %v837_v54 = vpop.f32.mrf.mxu0 }
 0x195   : > { %771 = vrot.lane.b32.xlu0 %v643_v48, %s2259_s19  ;;  %v1396_v17 = vpop.permute.xlu2 %1395 }
 0x196   : > { %v2854_v42 = vpop.permute.xlu1 %1317  ;;  %2176 = vmatmul.msk.f32.vlgmr.msrb.gmra.mxu2 %vm253_vm0, %v2747_v24  ;;  %2189 = vmatmul.msk.f32.gmra.mxu1 %vm253_vm0, %v1396_v17 }
 0x197   : > { %v924_v31 = vpop.permute.xlu0 %923  ;;  %2206 = vmatpush.xpose.msk.msrb.mxu2 %vm253_vm0, %v1677_v30 }
 0x198   : > { %2149 = vmatmul.msk.f32.gmra.mxu3 %vm253_vm0, %v924_v31 }
 0x19b   : > { %779 = vrot.lane.b32.xlu2 %v713_v7, %s2259_s19  ;;  %v716_v56 = vpop.f32.mrf.mxu2 }
 0x19c   : > { %785 = vrot.lane.b32.xlu1 %v751_v44, %s2259_s19  ;;  %v840_v62 = vpop.f32.mrf.mxu0 }
 0x19d   : > { %773 = vrot.lane.b32.xlu0 %v646_v43, %s2259_s19  ;;  %v1638_v45 = vpop.permute.xlu2 %1637 }
 0x19e   : > { %v2864_v49 = vpop.permute.xlu1 %1473  ;;  %2177 = vmatmul.msk.f32.gmra.mxu2 %vm253_vm0, %v1279_v27  ;;  %2202 = vmatpush.xpose.msk.msrb.mxu1 %vm253_vm0, %v1638_v45 }
 0x19f   : > { %v1599_v52 = vpop.permute.xlu0 %1598 }
 0x1a0   : > { %2198 = vmatpush.xpose.msk.msrb.mxu0 %vm253_vm0, %v1599_v52 }
 0x1a3   : > { %781 = vrot.lane.b32.xlu2 %v716_v56, %s2259_s19 }
 0x1a4   : > { %1124 = vrot.lane.b32.xlu1 %v837_v54, %s2261_s24  ;;  %v993_v16 = vpop.f32.mrf.mxu0 }
 0x1a5   : > { %783 = vrot.lane.b32.xlu0 %v748_v39, %s2259_s19  ;;  %v1322_v57 = vpop.permute.xlu2 %1321 }
 0x1a6   : > { %v1357_v59 = vpop.permute.xlu1 %1356  ;;  %2192 = vmatmul.msk.f32.vlgmr.msra.gmra.mxu2 %vm253_vm0, %v2763_v29 }
 0x1a7   : > { %v1714_v61 = vpop.permute.xlu0 %1713  ;;  %2185 = vmatmul.msk.f32.gmra.mxu0 %vm253_vm0, %v1357_v59 }
 0x1ab   : > { %1126 = vrot.lane.b32.xlu2 %v840_v62, %s2261_s24 }
 0x1ac   : > { %v996_v24 = vpop.f32.mrf.mxu0 }
 0x1ad   : > { %v1597_v3 = vpop.permute.xlu2 %1596 }
 0x1ae   : > { %v1675_v4 = vpop.permute.xlu1 %1674  ;;  %2193 = vmatmul.msk.f32.gmra.mxu2 %vm253_vm0, %v1435_v10  ;;  %2199 = vmatpush.xpose.msk.msrb.mxu0 %vm253_vm0, %v1597_v3 }
 0x1af   : > { %v1084_v5 = vpop.permute.xlu0 %1083  ;;  %2207 = vmatpush.xpose.msk.msrb.mxu2 %vm253_vm0, %v1675_v4 }
 0x1b0   : > { %2162 = vmatpush.xpose.msk.msra.mxu3 %vm253_vm0, %v1084_v5 }
 0x1b4   : > { %2163 = vmatpush.xpose.msk.msra.mxu3 %vm253_vm0, %v2795_v40  ;;  %v1231_v32 = vpop.f32.mrf.mxu0 }
 0x1b5   : > { %v1593_v38 = vpop.permute.xlu2 %1592 }
 0x1b6   : > { %v1671_v8 = vpop.permute.xlu1 %1670  ;;  %2200 = vmatmul.msk.f32.vlgmr.msrb.gmra.mxu0 %vm253_vm0, %v1593_v38 }
 0x1b7   : > { %v1478_v9 = vpop.permute.xlu0 %1477  ;;  %2164 = vmatmul.msk.f32.vlgmr.msra.gmra.mxu3 %vm253_vm0, %v1078_v37  ;;  %2208 = vmatmul.msk.f32.vlgmr.msrb.gmra.mxu2 %vm253_vm0, %v1671_v8 }
 0x1b8   : > { %2178 = vmatpush.xpose.msk.msrb.mxu3 %vm253_vm0, %v1322_v57 }
 0x1bc   : > { %2179 = vmatpush.xpose.msk.msrb.mxu3 %vm253_vm0, %v2808_v34 }
 0x1bd   : > { %v1712_v13 = vpop.permute.xlu2 %1711 }
 0x1be   : > { %v1636_v60 = vpop.permute.xlu1 %1635 }
 0x1bf   : > { %v1716_v12 = vpop.permute.xlu0 %1715  ;;  %2165 = vmatmul.msk.f32.gmra.mxu3 %vm253_vm0, %v1080_v35  ;;  %2203 = vmatpush.xpose.msk.msrb.mxu1 %vm253_vm0, %v1636_v60 }
 0x1c0   : > { %2194 = vmatpush.xpose.msk.msra.mxu3 %vm253_vm0, %v1478_v9 }
 0x1c4   : > { %2195 = vmatpush.xpose.msk.msra.mxu3 %vm253_vm0, %v2822_v51 }
 0x1c5   : > { %v1595_v14 = vpop.permute.xlu2 %1594 }
 0x1c6   : > { %v1673_v63 = vpop.permute.xlu1 %1672  ;;  %2201 = vmatmul.msk.f32.gmra.mxu0 %vm253_vm0, %v1595_v14 }
 0x1c7   : > { %v1710_v18 = vpop.permute.xlu0 %1709  ;;  %2180 = vmatmul.msk.f32.vlgmr.msrb.gmra.mxu3 %vm253_vm0, %v2824_v2  ;;  %2209 = vmatmul.msk.f32.gmra.mxu2 %vm253_vm0, %v1673_v63 }
 0x1c8   : > { %2210 = vmatpush.xpose.msk.msrb.mxu3 %vm253_vm0, %v1716_v12 }
 0x1cc   : > { %2211 = vmatpush.xpose.msk.msrb.mxu3 %vm253_vm0, %v1714_v61  ;;  %v876_v19 = vpop.f32.mrf.mxu1 }
 0x1cd   : > { %1128 = vrot.lane.b32.xlu0 %v876_v19, %s2261_s24  ;;  %v1831_v46 = vpop.permute.xlu2 %1830 }
 0x1ce   : > { %v1872_v1 = vpop.permute.xlu1 %1871 }
 0x1cf   : > { %v1632_v23 = vpop.permute.xlu0 %1631  ;;  %2181 = vmatmul.msk.f32.gmra.mxu3 %vm253_vm0, %v2854_v42 }
 0x1d0   : > { %2204 = vmatmul.msk.f32.vlgmr.msrb.gmra.mxu1 %vm253_vm0, %v1632_v23 }
 0x1d4   : > { %v879_v50 = vpop.f32.mrf.mxu1 }
 0x1d5   : > { %1130 = vrot.lane.b32.xlu1 %v879_v50, %s2261_s24  ;;  %1165 = vrot.lane.b32.xlu0 %v993_v16, %s2262_s25  ;;  %v1827_v11 = vpop.permute.xlu2 %1826 }
 0x1d6   : > { %v1755_v25 = vpop.permute.xlu1 %1754 }
 0x1d7   : > { %v1833_v29 = vpop.permute.xlu0 %1832  ;;  %2196 = vmatmul.msk.f32.vlgmr.msra.gmra.mxu3 %vm253_vm0, %v2783_v28  ;;  %2214 = vmatpush.xpose.msk.msra.mxu0 %vm253_vm0, %v1755_v25  ;;  %v1234_v28 = vpop.f32.mrf.mxu0 }
 0x1d8   : > { %2226 = vmatpush.xpose.msk.msra.mxu3 %vm253_vm0, %v1872_v1  ;;  %2222 = vmatpush.xpose.msk.msra.mxu2 %vm253_vm0, %v1833_v29 }
 0x1dc   : > { %v1032_v6 = vpop.f32.mrf.mxu1  ;;  %2223 = vmatpush.xpose.msk.msra.mxu2 %vm253_vm0, %v1831_v46 }
 0x1dd   : > { %1169 = vrot.lane.b32.xlu2 %v1032_v6, %s2262_s25  ;;  %1167 = vrot.lane.b32.xlu1 %v996_v24, %s2262_s25  ;;  %v1792_v15 = vpop.permute.xlu2 %1791 }
 0x1de   : > { %1518 = vrot.lane.b32.xlu0 %v1231_v32, %s2260_s23  ;;  %v1870_v33 = vpop.permute.xlu1 %1869 }
 0x1df   : > { %v1634_v47 = vpop.permute.xlu0 %1633  ;;  %2197 = vmatmul.msk.f32.gmra.mxu3 %vm253_vm0, %v2864_v49  ;;  %2224 = vmatmul.msk.f32.vlgmr.msra.gmra.mxu2 %vm253_vm0, %v1827_v11  ;;  %v1387_v35 = vpop.f32.mrf.mxu0 }
 0x1e0   : > { %2205 = vmatmul.msk.f32.gmra.mxu1 %vm253_vm0, %v1634_v47  ;;  %2227 = vmatpush.xpose.msk.msra.mxu3 %vm253_vm0, %v1870_v33 }
 0x1e4   : > { %v1035_v21 = vpop.f32.mrf.mxu1 }
 0x1e5   : > { %1520 = vrot.lane.b32.xlu1 %v1234_v28, %s2260_s23  ;;  %v1829_v20 = vpop.permute.xlu2 %1828 }
 0x1e6   : > { %1171 = vrot.lane.b32.xlu0 %v1035_v21, %s2262_s25  ;;  %v1866_v40 = vpop.permute.xlu1 %1865 }
 0x1e7   : > { %v1794_v0 = vpop.permute.xlu0 %1793  ;;  %2212 = vmatmul.msk.f32.vlgmr.msrb.gmra.mxu3 %vm253_vm0, %v1710_v18  ;;  %2225 = vmatmul.msk.f32.gmra.mxu2 %vm253_vm0, %v1829_v20 }
 0x1e8   : > { %2218 = vmatpush.xpose.msk.msra.mxu1 %vm253_vm0, %v1794_v0 }
 0x1ec   : > { %2219 = vmatpush.xpose.msk.msra.mxu1 %vm253_vm0, %v1792_v15  ;;  %v1270_v27 = vpop.f32.mrf.mxu1 }
 0x1ed   : > { %v1790_v58 = vpop.permute.xlu2 %1789 }
 0x1ee   : > { %v1788_v26 = vpop.permute.xlu1 %1787 }
 0x1ef   : > { %v1753_v34 = vpop.permute.xlu0 %1752  ;;  %2213 = vmatmul.msk.f32.gmra.mxu3 %vm253_vm0, %v1712_v13  ;;  %2220 = vmatmul.msk.f32.vlgmr.msra.gmra.mxu1 %vm253_vm0, %v1788_v26 }
 0x1f0   : > { %2215 = vmatpush.xpose.msk.msra.mxu0 %vm253_vm0, %v1753_v34 }
 0x1f4   : > { %v1273_v37 = vpop.f32.mrf.mxu1 }
 0x1f5   : > { %v780_v55 = vpop.permute.xlu2 %779 }
 0x1f6   : > { %v1751_v22 = vpop.permute.xlu1 %1750  ;;  %800 = vst.msk [vmem:[%s2681_s22 + $0x20] sm:$0xff] %vm795_vm2, %v780_v55 }
 0x1f7   : > { %v1749_v51 = vpop.permute.xlu0 %1748  ;;  %2228 = vmatmul.msk.f32.vlgmr.msra.gmra.mxu3 %vm253_vm0, %v1866_v40  ;;  %2221 = vmatmul.msk.f32.gmra.mxu1 %vm253_vm0, %v1790_v58 }
 0x1f8   : > { %2216 = vmatmul.msk.f32.vlgmr.msra.gmra.mxu0 %vm253_vm0, %v1749_v51 }
 0x1f9   : > { %v915_v2 = vpop.f32.mrf.mxu2 }
 0x1fa   : > { %1132 = vrot.lane.b32.xlu2 %v915_v2, %s2261_s24 }
 0x1fc   : > { %v1426_v49 = vpop.f32.mrf.mxu1 }
 0x1fd   : > { %v782_v39 = vpop.permute.xlu2 %781 }
 0x1fe   : > { %v776_v36 = vpop.permute.xlu1 %775  ;;  %801 = vst.msk [vmem:[%s2681_s22 + $0x28] sm:$0xff] %vm795_vm2, %v782_v39 }
 0x1ff   : > { %v1868_v10 = vpop.permute.xlu0 %1867  ;;  %798 = vst.msk [vmem:[%s2681_s22 + $0x10] sm:$0xff] %vm795_vm2, %v776_v36 }
 0x200   : > { %2217 = vmatmul.msk.f32.gmra.mxu0 %vm253_vm0, %v1751_v22  ;;  %2229 = vmatmul.msk.f32.gmra.mxu3 %vm253_vm0, %v1868_v10 }
 0x201   : > { %v918_v53 = vpop.f32.mrf.mxu2 }
 0x202   : > { %1522 = vrot.lane.b32.xlu2 %v1270_v27, %s2260_s23  ;;  %1134 = vrot.lane.b32.xlu0 %v918_v53, %s2261_s24 }
 0x205   : > { %v1127_v31 = vpop.permute.xlu2 %1126 }
 0x206   : > { %v778_v30 = vpop.permute.xlu1 %777 }
 0x207   : > { %v772_v48 = vpop.permute.xlu0 %771  ;;  %799 = vst.msk [vmem:[%s2681_s22 + $0x18] sm:$0xff] %vm795_vm2, %v778_v30 }
 0x208   : > { %796 = vst.msk [vmem:[%s2681_s22] sm:$0xff] %vm795_vm2, %v772_v48 }
 0x209   : > { %v1071_v7 = vpop.f32.mrf.mxu2 }
 0x20a   : > { %1524 = vrot.lane.b32.xlu0 %v1273_v37, %s2260_s23  ;;  %1559 = vrot.lane.b32.xlu2 %v1387_v35, %s2258_s18 }
 0x20e   : > { %v786_v41 = vpop.permute.xlu1 %785 }
 0x20f   : > { %v774_v17 = vpop.permute.xlu0 %773  ;;  %803 = vst.msk [vmem:[%s2681_s22 + $0x38] sm:$0xff] %vm795_vm2, %v786_v41 }
 0x210   : > { %797 = vst.msk [vmem:[%s2681_s22 + $0x8] sm:$0xff] %vm795_vm2, %v774_v17  ;;  %v954_v42 = vpop.f32.mrf.mxu3 }
 0x211   : > { %1136 = vrot.lane.b32.xlu1 %v954_v42, %s2261_s24  ;;  %1150 = vst.msk [vmem:[%s2681_s22 + $0x8] sm:$0xff] %vm1148_vm3, %v1127_v31  ;;  %v1074_v52 = vpop.f32.mrf.mxu2 }
 0x213   : > { %v1429_v56 = vpop.f32.mrf.mxu1 }
 0x216   : > { %v1125_v43 = vpop.permute.xlu1 %1124 }
 0x217   : > { %v784_v44 = vpop.permute.xlu0 %783  ;;  %1149 = vst.msk [vmem:[%s2681_s22] sm:$0xff] %vm1148_vm3, %v1125_v43 }
 0x218   : > { %802 = vst.msk [vmem:[%s2681_s22 + $0x30] sm:$0xff] %vm795_vm2, %v784_v44 }
 0x219   : > { %1173 = vrot.lane.b32.xlu1 %v1071_v7, %s2262_s25  ;;  %v1309_v61 = vpop.f32.mrf.mxu2 }
 0x21b   : > { %v957_v45 = vpop.f32.mrf.mxu3 }
 0x21c   : > { %1138 = vrot.lane.b32.xlu2 %v957_v45, %s2261_s24 }
 0x221   : > { %1563 = vrot.lane.b32.xlu1 %v1426_v49, %s2258_s18  ;;  %v1312_v38 = vpop.f32.mrf.mxu2 }
 0x224   : > { %1175 = vrot.lane.b32.xlu2 %v1074_v52, %s2262_s25  ;;  %v1390_v54 = vpop.f32.mrf.mxu0 }
 0x225   : > { %1561 = vrot.lane.b32.xlu0 %v1390_v54, %s2258_s18 }
 0x229   : > { %v1465_v63 = vpop.f32.mrf.mxu2 }
 0x22c   : > { %1565 = vrot.lane.b32.xlu2 %v1429_v56, %s2258_s18 }
 0x231   : > { %v1468_v1 = vpop.f32.mrf.mxu2 }
 0x233   : > { %v1625_v57 = vpop.f32.mrf.mxu0 }
 0x234   : > { %1912 = vrot.lane.b32.xlu1 %v1625_v57, %s2263_s26 }
 0x237   : > { %v1170_v8 = vpop.permute.xlu2 %1169 }
 0x23a   : > { %v1110_v59 = vpop.f32.mrf.mxu3  ;;  %v1703_v29 = vpop.f32.mrf.mxu2 }
 0x23b   : > { %1177 = vrot.lane.b32.xlu0 %v1110_v59, %s2262_s25 }
 0x23c   : > { %1526 = vrot.lane.b32.xlu1 %v1309_v61, %s2260_s23 }
 0x23f   : > { %v1129_v62 = vpop.permute.xlu0 %1128 }
 0x240   : > { %1151 = vst.msk [vmem:[%s2681_s22 + $0x10] sm:$0xff] %vm1148_vm3, %v1129_v62 }
 0x241   : > { %1192 = vst.msk [vmem:[%s2681_s22 + $0x10] sm:$0xff] %vm1189_vm4, %v1170_v8 }
 0x242   : > { %v1113_v3 = vpop.f32.mrf.mxu3 }
 0x243   : > { %v1628_v4 = vpop.f32.mrf.mxu0 }
 0x244   : > { %1179 = vrot.lane.b32.xlu1 %v1113_v3, %s2262_s25  ;;  %1914 = vrot.lane.b32.xlu2 %v1628_v4, %s2263_s26 }
 0x247   : > { %v1131_v5 = vpop.permute.xlu1 %1130  ;;  %v1166_v12 = vpop.permute.xlu0 %1165 }
 0x248   : > { %1152 = vst.msk [vmem:[%s2681_s22 + $0x18] sm:$0xff] %vm1148_vm3, %v1131_v5 }
 0x249   : > { %1190 = vst.msk [vmem:[%s2681_s22] sm:$0xff] %vm1189_vm4, %v1166_v12 }
 0x24a   : > { %v1348_v13 = vpop.f32.mrf.mxu3  ;;  %v1706_v33 = vpop.f32.mrf.mxu2 }
 0x24c   : > { %1528 = vrot.lane.b32.xlu2 %v1312_v38, %s2260_s23 }
 0x24d   : > { %v1664_v9 = vpop.f32.mrf.mxu1 }
 0x24e   : > { %1916 = vrot.lane.b32.xlu0 %v1664_v9, %s2263_s26 }
 0x24f   : > { %v1168_v25 = vpop.permute.xlu1 %1167 }
 0x250   : > { %v2979_v18 = vpop.permute.xlu0 %1518  ;;  %1191 = vst.msk [vmem:[%s2681_s22 + $0x8] sm:$0xff] %vm1189_vm4, %v1168_v25 }
 0x251   : > { %1543 = vst.msk [vmem:[%s2681_s22] sm:$0xff] %vm1542_vm5, %v2979_v18 }
 0x252   : > { %v1351_v14 = vpop.f32.mrf.mxu3 }
 0x254   : > { %v1133_v60 = vpop.permute.xlu2 %1132 }
 0x255   : > { %1153 = vst.msk [vmem:[%s2681_s22 + $0x20] sm:$0xff] %vm1148_vm3, %v1133_v60 }
 0x257   : > { %v1521_v28 = vpop.permute.xlu1 %1520 }
 0x258   : > { %v1172_v23 = vpop.permute.xlu0 %1171  ;;  %1544 = vst.msk [vmem:[%s2681_s22 + $0x8] sm:$0xff] %vm1542_vm5, %v1521_v28 }
 0x259   : > { %1193 = vst.msk [vmem:[%s2681_s22 + $0x18] sm:$0xff] %vm1189_vm4, %v1172_v23 }
 0x25a   : > { %v1504_v46 = vpop.f32.mrf.mxu3 }
 0x25c   : > { %v2981_v19 = vpop.permute.xlu2 %1522 }
 0x25d   : > { %v1667_v16 = vpop.f32.mrf.mxu1  ;;  %1545 = vst.msk [vmem:[%s2681_s22 + $0x10] sm:$0xff] %vm1542_vm5, %v2981_v19 }
 0x25e   : > { %1918 = vrot.lane.b32.xlu1 %v1667_v16, %s2263_s26 }
 0x262   : > { %v1507_v11 = vpop.f32.mrf.mxu3  ;;  %v1859_v40 = vpop.f32.mrf.mxu2 }
 0x264   : > { %v2984_v50 = vpop.permute.xlu2 %1559 }
 0x265   : > { %1584 = vst.msk [vmem:[%s2681_s22] sm:$0xff] %vm1583_vm6, %v2984_v50 }
 0x26a   : > { %v1742_v47 = vpop.f32.mrf.mxu3  ;;  %v1862_v58 = vpop.f32.mrf.mxu2 }
 0x26c   : > { %v1820_v24 = vpop.f32.mrf.mxu1 }
 0x26d   : > { %1957 = vrot.lane.b32.xlu2 %v1820_v24, %s2264_s27 }
 0x272   : > { %v1745_v26 = vpop.f32.mrf.mxu3 }
 0x274   : > { %v1135_v32 = vpop.permute.xlu0 %1134  ;;  %v1823_v22 = vpop.f32.mrf.mxu1 }
 0x275   : > { %1154 = vst.msk [vmem:[%s2681_s22 + $0x28] sm:$0xff] %vm1148_vm3, %v1135_v32  ;;  %v1781_v6 = vpop.f32.mrf.mxu0  ;;  %1571 = vrot.lane.b32.xlu2 %v1504_v46, %s2258_s18 }
 0x276   : > { %v1139_v15 = vpop.permute.xlu2 %1138  ;;  %1953 = vrot.lane.b32.xlu0 %v1781_v6, %s2264_s27 }
 0x277   : > { %1156 = vst.msk [vmem:[%s2681_s22 + $0x38] sm:$0xff] %vm1148_vm3, %v1139_v15 }
 0x27a   : > { %v1898_v51 = vpop.f32.mrf.mxu3 }
 0x27c   : > { %v1525_v2 = vpop.permute.xlu0 %1524 }
 0x27d   : > { %v1784_v21 = vpop.f32.mrf.mxu0  ;;  %1920 = vrot.lane.b32.xlu2 %v1703_v29, %s2263_s26  ;;  %1546 = vst.msk [vmem:[%s2681_s22 + $0x18] sm:$0xff] %vm1542_vm5, %v1525_v2 }
 0x27e   : > { %v1176_v20 = vpop.permute.xlu2 %1175  ;;  %1530 = vrot.lane.b32.xlu0 %v1348_v13, %s2260_s23  ;;  %1955 = vrot.lane.b32.xlu1 %v1784_v21, %s2264_s27 }
 0x27f   : > { %1195 = vst.msk [vmem:[%s2681_s22 + $0x28] sm:$0xff] %vm1189_vm4, %v1176_v20 }
 0x283   : > { %v1137_v0 = vpop.permute.xlu1 %1136  ;;  %v1901_v36 = vpop.f32.mrf.mxu3 }
 0x284   : > { %1155 = vst.msk [vmem:[%s2681_s22 + $0x30] sm:$0xff] %vm1148_vm3, %v1137_v0 }
 0x285   : > { %1926 = vrot.lane.b32.xlu2 %v1745_v26, %s2263_s26 }
 0x286   : > { %1567 = vrot.lane.b32.xlu0 %v1465_v63, %s2258_s18  ;;  %1532 = vrot.lane.b32.xlu1 %v1351_v14, %s2260_s23  ;;  %v1566_v53 = vpop.permute.xlu2 %1565 }
 0x287   : > { %1587 = vst.msk [vmem:[%s2681_s22 + $0x18] sm:$0xff] %vm1583_vm6, %v1566_v53 }
 0x28b   : > { %v1174_v34 = vpop.permute.xlu1 %1173 }
 0x28c   : > { %1194 = vst.msk [vmem:[%s2681_s22 + $0x20] sm:$0xff] %vm1189_vm4, %v1174_v34 }
 0x28d   : > { %1963 = vrot.lane.b32.xlu2 %v1862_v58, %s2264_s27 }
 0x28e   : > { %1959 = vrot.lane.b32.xlu0 %v1823_v22, %s2264_s27  ;;  %1569 = vrot.lane.b32.xlu1 %v1468_v1, %s2258_s18 }
 0x293   : > { %v1564_v27 = vpop.permute.xlu1 %1563 }
 0x294   : > { %1586 = vst.msk [vmem:[%s2681_s22 + $0x10] sm:$0xff] %vm1583_vm6, %v1564_v27 }
 0x296   : > { %1573 = vrot.lane.b32.xlu0 %v1507_v11, %s2258_s18  ;;  %1924 = vrot.lane.b32.xlu1 %v1742_v47, %s2263_s26 }
 0x297   : > { %v1562_v55 = vpop.permute.xlu0 %1561 }
 0x298   : > { %1585 = vst.msk [vmem:[%s2681_s22 + $0x8] sm:$0xff] %vm1583_vm6, %v1562_v55 }
 0x29e   : > { %1922 = vrot.lane.b32.xlu0 %v1706_v33, %s2263_s26  ;;  %1961 = vrot.lane.b32.xlu1 %v1859_v40, %s2264_s27  ;;  %v1915_v35 = vpop.permute.xlu2 %1914 }
 0x29f   : > { %1938 = vst.msk [vmem:[%s2681_s22 + $0x8] sm:$0xff] %vm1936_vm7, %v1915_v35 }
 0x2a6   : > { %1965 = vrot.lane.b32.xlu0 %v1898_v51, %s2264_s27  ;;  %1967 = vrot.lane.b32.xlu1 %v1901_v36, %s2264_s27  ;;  %v1913_v10 = vpop.permute.xlu1 %1912  ;;  %v1529_v39 = vpop.permute.xlu2 %1528 }
 0x2a7   : > { %1548 = vst.msk [vmem:[%s2681_s22 + $0x28] sm:$0xff] %vm1542_vm5, %v1529_v39 }
 0x2a8   : > { %1937 = vst.msk [vmem:[%s2681_s22] sm:$0xff] %vm1936_vm7, %v1913_v10 }
 0x2ad   : > { %v1178_v30 = vpop.permute.xlu0 %1177 }
 0x2ae   : > { %1196 = vst.msk [vmem:[%s2681_s22 + $0x30] sm:$0xff] %vm1189_vm4, %v1178_v30  ;;  %v1527_v48 = vpop.permute.xlu1 %1526 }
 0x2af   : > { %1547 = vst.msk [vmem:[%s2681_s22 + $0x20] sm:$0xff] %vm1542_vm5, %v1527_v48 }
 0x2b6   : > { %v1180_v37 = vpop.permute.xlu1 %1179 }
 0x2b7   : > { %1197 = vst.msk [vmem:[%s2681_s22 + $0x38] sm:$0xff] %vm1189_vm4, %v1180_v37 }
 0x2c0   : > { %v1917_v41 = vpop.permute.xlu0 %1916 }
 0x2c1   : > { %1939 = vst.msk [vmem:[%s2681_s22 + $0x10] sm:$0xff] %vm1936_vm7, %v1917_v41 }
 0x2c7   : > { %v1958_v31 = vpop.permute.xlu2 %1957 }
 0x2c8   : > { %1980 = vst.msk [vmem:[%s2681_s22 + $0x10] sm:$0xff] %vm1977_vm8, %v1958_v31 }
 0x2cf   : > { %v1572_v7 = vpop.permute.xlu2 %1571 }
 0x2d0   : > { %v1919_v17 = vpop.permute.xlu1 %1918 }
 0x2d1   : > { %1940 = vst.msk [vmem:[%s2681_s22 + $0x18] sm:$0xff] %vm1936_vm7, %v1919_v17 }
 0x2d7   : > { %v1921_v52 = vpop.permute.xlu2 %1920 }
 0x2df   : > { %v1927_v61 = vpop.permute.xlu2 %1926 }
 0x2e7   : > { %v1964_v4 = vpop.permute.xlu2 %1963 }
 0x2e8   : > { %v1954_v42 = vpop.permute.xlu0 %1953 }
 0x2e9   : > { %1978 = vst.msk [vmem:[%s2681_s22] sm:$0xff] %vm1977_vm8, %v1954_v42 }
 0x2f0   : > { %v1531_v43 = vpop.permute.xlu0 %1530  ;;  %v1956_v44 = vpop.permute.xlu1 %1955 }
 0x2f1   : > { %1549 = vst.msk [vmem:[%s2681_s22 + $0x30] sm:$0xff] %vm1542_vm5, %v1531_v43 }
 0x2f2   : > { %1590 = vst.msk [vmem:[%s2681_s22 + $0x30] sm:$0xff] %vm1583_vm6, %v1572_v7 }
 0x2f3   : > { %1979 = vst.msk [vmem:[%s2681_s22 + $0x8] sm:$0xff] %vm1977_vm8, %v1956_v44 }
 0x2f8   : > { %v1568_v45 = vpop.permute.xlu0 %1567  ;;  %v1533_v49 = vpop.permute.xlu1 %1532 }
 0x2f9   : > { %1588 = vst.msk [vmem:[%s2681_s22 + $0x20] sm:$0xff] %vm1583_vm6, %v1568_v45 }
 0x2fa   : > { %1550 = vst.msk [vmem:[%s2681_s22 + $0x38] sm:$0xff] %vm1542_vm5, %v1533_v49 }
 0x2fb   : > { %1941 = vst.msk [vmem:[%s2681_s22 + $0x20] sm:$0xff] %vm1936_vm7, %v1921_v52 }
 0x300   : > { %v1960_v54 = vpop.permute.xlu0 %1959  ;;  %v1570_v56 = vpop.permute.xlu1 %1569 }
 0x301   : > { %1589 = vst.msk [vmem:[%s2681_s22 + $0x28] sm:$0xff] %vm1583_vm6, %v1570_v56 }
 0x302   : > { %1981 = vst.msk [vmem:[%s2681_s22 + $0x18] sm:$0xff] %vm1977_vm8, %v1960_v54 }
 0x308   : > { %v1574_v57 = vpop.permute.xlu0 %1573  ;;  %v1925_v59 = vpop.permute.xlu1 %1924 }
 0x309   : > { %1591 = vst.msk [vmem:[%s2681_s22 + $0x38] sm:$0xff] %vm1583_vm6, %v1574_v57 }
 0x30a   : > { %1943 = vst.msk [vmem:[%s2681_s22 + $0x30] sm:$0xff] %vm1936_vm7, %v1925_v59 }
 0x30b   : > { %1944 = vst.msk [vmem:[%s2681_s22 + $0x38] sm:$0xff] %vm1936_vm7, %v1927_v61 }
 0x310   : > { %v1923_v62 = vpop.permute.xlu0 %1922  ;;  %v1962_v3 = vpop.permute.xlu1 %1961 }
 0x311   : > { %1942 = vst.msk [vmem:[%s2681_s22 + $0x28] sm:$0xff] %vm1936_vm7, %v1923_v62 }
 0x312   : > { %1982 = vst.msk [vmem:[%s2681_s22 + $0x20] sm:$0xff] %vm1977_vm8, %v1962_v3 }
 0x313   : > { %1983 = vst.msk [vmem:[%s2681_s22 + $0x28] sm:$0xff] %vm1977_vm8, %v1964_v4 }
 0x318   : > { %v1966_v5 = vpop.permute.xlu0 %1965  ;;  %v1968_v38 = vpop.permute.xlu1 %1967 }
 0x319   : > { %1984 = vst.msk [vmem:[%s2681_s22 + $0x30] sm:$0xff] %vm1977_vm8, %v1966_v5 }
 0x31a   : > { %1985 = vst.msk [vmem:[%s2681_s22 + $0x38] sm:$0xff] %vm1977_vm8, %v1968_v38 }
 0x31b PF: > { %s14_s15 = sadd.s32 1, %s2256_s15  }
 0x31c   : > { %p11_p4 = scmp.ge.s32.totalorder %s14_s15, 4  }
 0x31e   :  { %13 = sbr.rel (!%p11_p4) target bundleno = 1 (0x1), region = 69 }

</bundles_post_ra>
